<compile_context>
chip_gen: v6e
topology: v6e:2x2x1
jax: 0.10.0
libtpu: 0.0.40
codegen_flags: <defaults>
</compile_context>

<pallas_src>
import functools

import jax
import jax.numpy as jnp
from jax.experimental import pallas as pl
from jax.experimental.pallas import tpu as pltpu


def _round_up(x, m):
    return (x + m - 1) // m * m


def _permute_gate_cols(w, hidden_size):
    """Reorder last-axis gate blocks from PyTorch [i, f, g, o] to [i, f, o, g]."""
    H = hidden_size
    return jnp.concatenate(
        [w[..., 0:H], w[..., H:2 * H], w[..., 3 * H:4 * H], w[..., 2 * H:3 * H]],
        axis=-1)


def _lstm_cell_step(gates, c_prev, lane_mask, H):
    """Gate epilogue.  gates: (BB, 4H) f32 in [i, f, o, g] column order.

    sigmoid and tanh are evaluated over the full 4H lane width (EUP slot is
    otherwise idle) and blended with a precomputed lane mask, avoiding
    sub-vreg slicing before the transcendentals on the serial path.
    """
    act = jnp.where(lane_mask, jax.nn.sigmoid(gates), jnp.tanh(gates))
    i_g = act[:, 0:H]
    f_g = act[:, H:2 * H]
    o_g = act[:, 2 * H:3 * H]
    g_g = act[:, 3 * H:4 * H]
    c_new = f_g * c_prev + i_g * g_g
    h_new = o_g * jnp.tanh(c_new)
    return h_new, c_new


# ---------------------------------------------------------------------------
# Kernel A: fully fused encoder (all layers in one pallas_call).
# Grid = (batch_blocks,).  Inter-layer activations live in VMEM scratch; only
# (hidden, cell) are written back to HBM.
# ---------------------------------------------------------------------------
def _fused_stack_kernel(*refs, num_layers, hidden_size, seq_len, unroll):
    # refs: x, (w_ih, w_hh, bias) per layer, h_out, c_out, gx_sc, act_sc
    x_ref = refs[0]
    w_refs = refs[1:1 + 3 * num_layers]
    h_out_ref = refs[1 + 3 * num_layers]
    c_out_ref = refs[2 + 3 * num_layers]
    gx_sc = refs[3 + 3 * num_layers]      # (T, BB, 4H) f32
    act_sc = refs[4 + 3 * num_layers]     # (T, BB, H)  bf16 inter-layer acts

    H = hidden_size
    T, BB = gx_sc.shape[0], gx_sc.shape[1]
    # Hoisted lane mask: lanes [0, 3H) -> sigmoid, [3H, 4H) -> tanh.
    lane_mask = jax.lax.broadcasted_iota(jnp.int32, (BB, 4 * H), 1) < 3 * H

    for layer in range(num_layers):
        w_ih = w_refs[3 * layer][...]       # (in_dim, 4H) bf16
        w_hh = w_refs[3 * layer + 1][...]   # (H, 4H) f32 (serial path stays f32)
        bias = w_refs[3 * layer + 2][...]   # (1, 4H) f32

        x_in = x_ref[...] if layer == 0 else act_sc[...]   # (T, BB, in_dim) bf16
        in_dim = x_in.shape[-1]

        # (1) Input projection for the whole sequence chunk, off the serial
        #     h-recurrence path: one (T*BB, in_dim) @ (in_dim, 4H) bf16 matmul.
        #     Leading-dim reshapes are layout no-ops.
        gx = jnp.dot(x_in.reshape(T * BB, in_dim), w_ih,
                     preferred_element_type=jnp.float32) + bias
        gx_sc[...] = gx.reshape(T, BB, 4 * H)

        store_act = layer < num_layers - 1

        def step(t, carry, w_hh=w_hh, store_act=store_act):
            h_prev, c_prev = carry
            gates = gx_sc[t] + jnp.dot(h_prev, w_hh,
                                       preferred_element_type=jnp.float32)
            h_new, c_new = _lstm_cell_step(gates, c_prev, lane_mask, H)
            if store_act:
                act_sc[t] = h_new.astype(act_sc.dtype)
            return h_new, c_new

        zeros = jnp.zeros((BB, H), jnp.float32)
        h_fin, c_fin = jax.lax.fori_loop(0, seq_len, step, (zeros, zeros),
                                         unroll=unroll)
        h_out_ref[layer] = h_fin
        c_out_ref[layer] = c_fin


def _fused_stack_vmem_bytes(seq_len, batch_block, emb_size, H, num_layers):
    """Conservative VMEM footprint estimate for the fused-stack kernel."""
    gx_sc = seq_len * batch_block * 4 * H * 4
    act_sc = seq_len * batch_block * H * 2
    x_blk = 2 * seq_len * batch_block * emb_size * 2        # double-buffered bf16
    w = 0
    for layer in range(num_layers):
        ind = emb_size if layer == 0 else H
        w += 2 * (ind * 4 * H * 2 + H * 4 * H * 4 + 4 * H * 4)
    outs = 2 * 2 * num_layers * batch_block * H * 4
    temps = 2 * seq_len * batch_block * 4 * H * 4           # live gx / x2d values
    return gx_sc + act_sc + x_blk + w + outs + temps


def _encoder_fused_stack(x_emb, params, batch_block, unroll):
    """x_emb: (seq_len, batch_pad, E) bf16 -> (h, c), each (L, batch_pad, H) f32."""
    seq_len, batch_pad, E = x_emb.shape
    H = params.hidden_size
    L = params.num_layers
    nb = batch_pad // batch_block

    inputs = [x_emb]
    in_specs = [pl.BlockSpec((seq_len, batch_block, E), lambda b: (0, b, 0))]
    for layer in range(L):
        w_ih = params.w_ih_t[layer]   # (in_dim, 4H) bf16
        w_hh = params.w_hh_t[layer]   # (H, 4H) f32
        bias = params.bias[layer]     # (1, 4H) f32
        inputs += [w_ih, w_hh, bias]
        in_specs += [
            pl.BlockSpec(w_ih.shape, lambda b: (0, 0)),
            pl.BlockSpec(w_hh.shape, lambda b: (0, 0)),
            pl.BlockSpec(bias.shape, lambda b: (0, 0)),
        ]

    out_shape = (jax.ShapeDtypeStruct((L, batch_pad, H), jnp.float32),
                 jax.ShapeDtypeStruct((L, batch_pad, H), jnp.float32))
    out_specs = [pl.BlockSpec((L, batch_block, H), lambda b: (0, b, 0)),
                 pl.BlockSpec((L, batch_block, H), lambda b: (0, b, 0))]
    scratch = [pltpu.VMEM((seq_len, batch_block, 4 * H), jnp.float32),
               pltpu.VMEM((seq_len, batch_block, H), jnp.bfloat16)]

    flops = 0
    trans = 0
    for layer in range(L):
        ind = E if layer == 0 else H
        flops += 2 * seq_len * batch_pad * 4 * H * (ind + H)
        trans += seq_len * batch_pad * 9 * H          # sigmoid+tanh(4H) + tanh(H)
    bytes_acc = (x_emb.size * 2
                 + sum(int(w.size) * w.dtype.itemsize for w in inputs[1:])
                 + 2 * L * batch_pad * H * 4)

    kernel = functools.partial(
        _fused_stack_kernel, num_layers=L, hidden_size=H, seq_len=seq_len,
        unroll=unroll)
    return pl.pallas_call(
        kernel,
        out_shape=out_shape,
        grid_spec=pltpu.PrefetchScalarGridSpec(
            num_scalar_prefetch=0,
            grid=(nb,),
            in_specs=in_specs,
            out_specs=out_specs,
            scratch_shapes=scratch),
        compiler_params=pltpu.CompilerParams(
            dimension_semantics=("parallel",)),
        cost_estimate=pl.CostEstimate(flops=int(flops),
                                      transcendentals=int(trans),
                                      bytes_accessed=int(bytes_acc)),
    )(*inputs)


# ---------------------------------------------------------------------------
# Kernel B: per-layer fallback (large shapes).  Grid = (batch_blocks,
# time_chunks); the per-chunk input projection is fused into the kernel and
# runs off the serial path; h/c carried in VMEM scratch across time chunks.
# ---------------------------------------------------------------------------
def _lstm_layer_kernel(x_ref, wih_ref, whh_ref, b_ref, *rest, hidden_size,
                       t_chunk, seq_len, needs_mask, emit_out, unroll):
    if emit_out:
        out_ref, h_out_ref, c_out_ref, gx_sc, h_sc, c_sc = rest
    else:
        out_ref = None
        h_out_ref, c_out_ref, gx_sc, h_sc, c_sc = rest

    H = hidden_size
    BB = h_sc.shape[0]
    t_blk = pl.program_id(1)

    @pl.when(t_blk == 0)
    def _():
        h_sc[...] = jnp.zeros_like(h_sc)
        c_sc[...] = jnp.zeros_like(c_sc)

    # Fused per-chunk input projection (off the serial recurrence path).
    in_dim = x_ref.shape[-1]
    gx = jnp.dot(x_ref[...].reshape(t_chunk * BB, in_dim), wih_ref[...],
                 preferred_element_type=jnp.float32) + b_ref[...]
    gx_sc[...] = gx.reshape(t_chunk, BB, 4 * H)

    w_hh = whh_ref[...]
    lane_mask = jax.lax.broadcasted_iota(jnp.int32, (BB, 4 * H), 1) < 3 * H

    def step(lt, carry):
        h_prev, c_prev = carry
        gates = gx_sc[lt] + jnp.dot(h_prev, w_hh,
                                    preferred_element_type=jnp.float32)
        h_new, c_new = _lstm_cell_step(gates, c_prev, lane_mask, H)
        if needs_mask:   # only generated when the time axis is actually padded
            valid = (t_blk * t_chunk + lt) < seq_len
            h_new = jnp.where(valid, h_new, h_prev)
            c_new = jnp.where(valid, c_new, c_prev)
        if emit_out:
            out_ref[lt] = h_new.astype(out_ref.dtype)
        return h_new, c_new

    h_fin, c_fin = jax.lax.fori_loop(0, t_chunk, step, (h_sc[...], c_sc[...]),
                                     unroll=unroll)
    h_sc[...] = h_fin
    c_sc[...] = c_fin

    @pl.when(t_blk == pl.num_programs(1) - 1)
    def _():
        h_out_ref[...] = h_fin
        c_out_ref[...] = c_fin


def _lstm_layer(x_seq, w_ih, w_hh, bias, hidden_size, *, seq_len, t_chunk,
                batch_block, emit_out, unroll):
    """One LSTM layer over a (seq_pad, batch_pad, in_dim) bf16 sequence."""
    seq_pad, batch_pad, in_dim = x_seq.shape
    H = hidden_size
    nt = seq_pad // t_chunk
    nb = batch_pad // batch_block
    needs_mask = seq_pad != seq_len

    kernel = functools.partial(
        _lstm_layer_kernel, hidden_size=H, t_chunk=t_chunk, seq_len=seq_len,
        needs_mask=needs_mask, emit_out=emit_out, unroll=unroll)

    out_shape = []
    out_specs = []
    if emit_out:
        # Next layer consumes bf16, so emit inter-layer activations in bf16.
        # TODO(synk): for H < 128 this block is not lane-dense (masked vst);
        # a (seq_pad, batch_pad*H) 2-D output layout would fix it.
        out_shape.append(jax.ShapeDtypeStruct((seq_pad, batch_pad, H),
                                              jnp.bfloat16))
        out_specs.append(pl.BlockSpec((t_chunk, batch_block, H),
                                      lambda b, t: (t, b, 0)))
    out_shape += [jax.ShapeDtypeStruct((batch_pad, H), jnp.float32),
                  jax.ShapeDtypeStruct((batch_pad, H), jnp.float32)]
    out_specs += [pl.BlockSpec((batch_block, H), lambda b, t: (b, 0)),
                  pl.BlockSpec((batch_block, H), lambda b, t: (b, 0))]

    in_specs = [
        pl.BlockSpec((t_chunk, batch_block, in_dim), lambda b, t: (t, b, 0)),
        pl.BlockSpec(w_ih.shape, lambda b, t: (0, 0)),
        pl.BlockSpec(w_hh.shape, lambda b, t: (0, 0)),
        pl.BlockSpec(bias.shape, lambda b, t: (0, 0)),
    ]
    scratch = [pltpu.VMEM((t_chunk, batch_block, 4 * H), jnp.float32),
               pltpu.VMEM((batch_block, H), jnp.float32),
               pltpu.VMEM((batch_block, H), jnp.float32)]

    flops = 2 * seq_pad * batch_pad * 4 * H * (in_dim + H)
    trans = seq_pad * batch_pad * 9 * H
    bytes_acc = (x_seq.size * 2 + int(w_ih.size) * 2 + int(w_hh.size) * 4
                 + int(bias.size) * 4
                 + (seq_pad * batch_pad * H * 2 if emit_out else 0)
                 + 2 * batch_pad * H * 4)

    # Rough VMEM budget; only raise the scoped limit if we actually need it
    # (matters at large H, especially on v7x: 32 MiB default / 64 MiB phys).
    est_vmem = (2 * t_chunk * batch_block * in_dim * 2
                + (2 * t_chunk * batch_block * H * 2 if emit_out else 0)
                + 2 * (int(w_ih.size) * 2 + int(w_hh.size) * 4 + int(bias.size) * 4)
                + t_chunk * batch_block * 4 * H * 4
                + 6 * batch_block * H * 4)
    cp_kwargs = dict(dimension_semantics=("parallel", "arbitrary"))
    if est_vmem > 28 * 2 ** 20:
        cp_kwargs["vmem_limit_bytes"] = int(min(est_vmem * 5 // 4, 60 * 2 ** 20))

    return pl.pallas_call(
        kernel,
        out_shape=tuple(out_shape),
        grid_spec=pltpu.PrefetchScalarGridSpec(
            num_scalar_prefetch=0,
            grid=(nb, nt),                 # time (sequential) axis last
            in_specs=in_specs,
            out_specs=out_specs,
            scratch_shapes=scratch),
        compiler_params=pltpu.CompilerParams(**cp_kwargs),
        cost_estimate=pl.CostEstimate(flops=int(flops),
                                      transcendentals=int(trans),
                                      bytes_accessed=int(bytes_acc)),
    )(x_seq, w_ih, w_hh, bias)


# ---------------------------------------------------------------------------
# Parameters & forward
# ---------------------------------------------------------------------------
class EncoderParams:
    """Deterministic parameter init mirroring nn.Embedding + nn.LSTM shapes.

    Gate columns are stored pre-permuted to [i, f, o, g] (kernel layout).
    W_ih is stored bf16 (MXU-native for the hoisted projection); W_hh and the
    biases stay f32 so the serial recurrence path keeps f32 accumulation.
    """

    def __init__(self, key, input_size, embedding_size, hidden_size, num_layers):
        self.input_size = input_size
        self.embedding_size = embedding_size
        self.hidden_size = hidden_size
        self.num_layers = num_layers

        k_emb, key = jax.random.split(key)
        # nn.Embedding default init: N(0, 1)
        self.embedding = jax.random.normal(
            k_emb, (input_size, embedding_size), dtype=jnp.float32)

        bound = 1.0 / (hidden_size ** 0.5)
        self.w_ih_t, self.w_hh_t, self.bias = [], [], []
        for layer in range(num_layers):
            in_dim = embedding_size if layer == 0 else hidden_size
            k1, k2, k3, k4, key = jax.random.split(key, 5)
            w_ih = jax.random.uniform(k1, (4 * hidden_size, in_dim),
                                      minval=-bound, maxval=bound,
                                      dtype=jnp.float32)
            w_hh = jax.random.uniform(k2, (4 * hidden_size, hidden_size),
                                      minval=-bound, maxval=bound,
                                      dtype=jnp.float32)
            b_ih = jax.random.uniform(k3, (4 * hidden_size,),
                                      minval=-bound, maxval=bound,
                                      dtype=jnp.float32)
            b_hh = jax.random.uniform(k4, (4 * hidden_size,),
                                      minval=-bound, maxval=bound,
                                      dtype=jnp.float32)
            self.w_ih_t.append(
                _permute_gate_cols(w_ih.T, hidden_size).astype(jnp.bfloat16))
            self.w_hh_t.append(_permute_gate_cols(w_hh.T, hidden_size))
            self.bias.append(
                _permute_gate_cols((b_ih + b_hh)[None, :], hidden_size))


def encoder_forward(params: EncoderParams, x_tokens, *, force_per_layer=False,
                    fused_vmem_budget=12 * 2 ** 20):
    """x_tokens: (seq_len, batch) int32 -> (hidden, cell), each (L, batch, H)."""
    seq_len, batch = x_tokens.shape
    E, H, L = params.embedding_size, params.hidden_size, params.num_layers

    # Embedding lookup (glue, plain JAX gather).
    emb = jnp.take(params.embedding, x_tokens, axis=0)        # (S, B, E) f32
    # TODO(synk): training-mode stochastic dropout (on the embedding and
    # between LSTM layers) is not reproduced; eval-mode identity only.
    emb = emb.astype(jnp.bfloat16)                            # bf16 MXU operand

    # Batch blocking: one large block (MXU-friendly rows on the serial path).
    batch_pad = _round_up(batch, 8)
    if batch_pad <= 128:
        batch_block = batch_pad
    else:
        batch_pad = _round_up(batch, 128)
        batch_block = 128
    # NOTE(v7x): with 2 TensorCores per chip, keeping >= 2 batch blocks on the
    # "parallel" grid axis lets the grid shard across cores when batch permits.

    x = jnp.pad(emb, ((0, 0), (0, batch_pad - batch), (0, 0)))

    # Path A: whole layer stack fused into one pallas_call when it fits VMEM.
    fused_bytes = _fused_stack_vmem_bytes(seq_len, batch_block, E, H, L)
    if not force_per_layer and fused_bytes <= fused_vmem_budget:
        h, c = _encoder_fused_stack(x, params, batch_block,
                                    unroll=min(seq_len, 8))
        return h[:, :batch], c[:, :batch]

    # Path B: per-layer kernels (projection fused into the chunked recurrence).
    t_chunk = seq_len if seq_len <= 32 else 32
    seq_pad = _round_up(seq_len, t_chunk)
    x = jnp.pad(x, ((0, seq_pad - seq_len), (0, 0), (0, 0)))

    hiddens, cells = [], []
    layer_in = x
    for layer in range(L):
        emit_out = layer < L - 1       # last layer's out_seq is never consumed
        res = _lstm_layer(layer_in, params.w_ih_t[layer], params.w_hh_t[layer],
                          params.bias[layer], H, seq_len=seq_len,
                          t_chunk=t_chunk, batch_block=batch_block,
                          emit_out=emit_out, unroll=min(t_chunk, 8))
        if emit_out:
            layer_in, h_f, c_f = res
        else:
            h_f, c_f = res
        hiddens.append(h_f[:batch])
        cells.append(c_f[:batch])
    return jnp.stack(hiddens, 0), jnp.stack(cells, 0)


def encoder_reference(params: EncoderParams, x_tokens):
    """Pure-JAX f32 reference (eval mode) using the same gate-permuted params."""
    H = params.hidden_size
    emb = jnp.take(params.embedding, x_tokens, axis=0)   # (S, B, E) f32
    layer_in = emb
    hiddens, cells = [], []
    for layer in range(params.num_layers):
        w_ih = params.w_ih_t[layer].astype(jnp.float32)
        w_hh = params.w_hh_t[layer]
        b = params.bias[layer]

        def step(carry, x_t, w_ih=w_ih, w_hh=w_hh, b=b):
            h, c = carry
            gates = (jnp.dot(x_t, w_ih, precision=jax.lax.Precision.HIGHEST)
                     + jnp.dot(h, w_hh, precision=jax.lax.Precision.HIGHEST)
                     + b)
            i = jax.nn.sigmoid(gates[:, 0:H])
            f = jax.nn.sigmoid(gates[:, H:2 * H])
            o = jax.nn.sigmoid(gates[:, 2 * H:3 * H])
            g = jnp.tanh(gates[:, 3 * H:])
            c_new = f * c + i * g
            h_new = o * jnp.tanh(c_new)
            return (h_new, c_new), h_new

        batch = layer_in.shape[1]
        init = (jnp.zeros((batch, H), jnp.float32),
                jnp.zeros((batch, H), jnp.float32))
        (h_f, c_f), outs = jax.lax.scan(step, init, layer_in)
        hiddens.append(h_f)
        cells.append(c_f)
        layer_in = outs
    return jnp.stack(hiddens, 0), jnp.stack(cells, 0)


if __name__ == "__main__":
    # Small shapes consistent with the module's forward.
    input_size = 50        # vocab size
    embedding_size = 32
    hidden_size = 32
    num_layers = 2
    seq_len = 8
    batch = 4

    key = jax.random.PRNGKey(0)
    k_params, k_tokens = jax.random.split(key)

    params = EncoderParams(k_params, input_size, embedding_size,
                           hidden_size, num_layers)
    x_tokens = jax.random.randint(
        k_tokens, (seq_len, batch), minval=0, maxval=input_size,
        dtype=jnp.int32)

    h_ref, c_ref = encoder_reference(params, x_tokens)

    # Path A: fully fused multi-layer kernel (used automatically at this size).
    hidden, cell = encoder_forward(params, x_tokens)
    jax.block_until_ready((hidden, cell))
    assert hidden.shape == (num_layers, batch, hidden_size)
    assert cell.shape == (num_layers, batch, hidden_size)
    err_h = float(jnp.max(jnp.abs(hidden - h_ref)))
    err_c = float(jnp.max(jnp.abs(cell - c_ref)))
    assert err_h < 2e-2 and err_c < 2e-2, ("fused", err_h, err_c)

    # Path B: per-layer fallback kernel (exercised explicitly for coverage).
    hidden_b, cell_b = encoder_forward(params, x_tokens, force_per_layer=True)
    jax.block_until_ready((hidden_b, cell_b))
    err_hb = float(jnp.max(jnp.abs(hidden_b - h_ref)))
    err_cb = float(jnp.max(jnp.abs(cell_b - c_ref)))
    assert err_hb < 2e-2 and err_cb < 2e-2, ("per_layer", err_hb, err_cb)

    print("KERNEL_OK")
</pallas_src>

<mosaic_0001>
module attributes {stable_mosaic.version = 11 : i64} {
  func.func @_fused_stack_kernel(%arg0: i32, %arg1: memref<8x8x32xbf16, #tpu.memory_space<vmem>>, %arg2: memref<32x128xbf16, #tpu.memory_space<vmem>>, %arg3: memref<32x128xf32, #tpu.memory_space<vmem>>, %arg4: memref<1x128xf32, #tpu.memory_space<vmem>>, %arg5: memref<32x128xbf16, #tpu.memory_space<vmem>>, %arg6: memref<32x128xf32, #tpu.memory_space<vmem>>, %arg7: memref<1x128xf32, #tpu.memory_space<vmem>>, %arg8: memref<2x8x32xf32, #tpu.memory_space<vmem>>, %arg9: memref<2x8x32xf32, #tpu.memory_space<vmem>>, %arg10: memref<8x8x128xf32, #tpu.memory_space<vmem>>, %arg11: memref<8x8x32xbf16, #tpu.memory_space<vmem>>) attributes {dimension_semantics = [#tpu.dimension_semantics<parallel>], iteration_bounds = array<i64: 1>, scalar_prefetch = 0 : i64, scratch_operands = 2 : i64, tpu.core_type = #tpu.core_type<tc>, window_params = [{transform_indices = @transform_0, window_bounds = array<i64: 8, 8, 32>}, {pipeline_mode = #tpu.pipeline_mode<synchronous>, transform_indices = @transform_1, window_bounds = array<i64: 32, 128>}, {pipeline_mode = #tpu.pipeline_mode<synchronous>, transform_indices = @transform_2, window_bounds = array<i64: 32, 128>}, {pipeline_mode = #tpu.pipeline_mode<synchronous>, transform_indices = @transform_3, window_bounds = array<i64: 1, 128>}, {pipeline_mode = #tpu.pipeline_mode<synchronous>, transform_indices = @transform_4, window_bounds = array<i64: 32, 128>}, {pipeline_mode = #tpu.pipeline_mode<synchronous>, transform_indices = @transform_5, window_bounds = array<i64: 32, 128>}, {pipeline_mode = #tpu.pipeline_mode<synchronous>, transform_indices = @transform_6, window_bounds = array<i64: 1, 128>}, {transform_indices = @transform_7, window_bounds = array<i64: 2, 8, 32>}, {transform_indices = @transform_8, window_bounds = array<i64: 2, 8, 32>}]} {
    %0 = tpu.iota {dimensions = array<i32: 1>} : vector<8x128xi32>
    %c96_i32 = arith.constant 96 : i32
    %1 = vector.broadcast %c96_i32 : i32 to vector<8x128xi32>
    %2 = arith.cmpi slt, %0, %1 : vector<8x128xi32>
    %c0 = arith.constant 0 : index
    %c0_0 = arith.constant 0 : index
    %3 = vector.load %arg2[%c0, %c0_0] : memref<32x128xbf16, #tpu.memory_space<vmem>>, vector<32x128xbf16>
    %c0_1 = arith.constant 0 : index
    %c0_2 = arith.constant 0 : index
    %4 = vector.load %arg3[%c0_1, %c0_2] : memref<32x128xf32, #tpu.memory_space<vmem>>, vector<32x128xf32>
    %c0_3 = arith.constant 0 : index
    %c0_4 = arith.constant 0 : index
    %5 = vector.load %arg4[%c0_3, %c0_4] : memref<1x128xf32, #tpu.memory_space<vmem>>, vector<1x128xf32>
    %c0_5 = arith.constant 0 : index
    %c0_6 = arith.constant 0 : index
    %c0_7 = arith.constant 0 : index
    %6 = vector.load %arg1[%c0_5, %c0_6, %c0_7] : memref<8x8x32xbf16, #tpu.memory_space<vmem>>, vector<8x8x32xbf16>
    %7 = vector.shape_cast %6 : vector<8x8x32xbf16> to vector<64x32xbf16>
    %cst = arith.constant dense<0.000000e+00> : vector<64x128xf32>
    %8 = tpu.matmul %7, %3, %cst {dimension_numbers = #tpu.dot_dimension_numbers<[1], [0], [0], [1], [0, 0, 1, 1], [], []>} : vector<64x32xbf16>, vector<32x128xbf16>, vector<64x128xf32> -> vector<64x128xf32>
    %9 = vector.broadcast %5 : vector<1x128xf32> to vector<64x128xf32>
    %10 = arith.addf %8, %9 : vector<64x128xf32>
    %11 = vector.shape_cast %10 : vector<64x128xf32> to vector<8x8x128xf32>
    %c0_8 = arith.constant 0 : index
    %c0_9 = arith.constant 0 : index
    %c0_10 = arith.constant 0 : index
    %12 = vector.load %arg10[%c0_8, %c0_9, %c0_10] : memref<8x8x128xf32, #tpu.memory_space<vmem>>, vector<8x8x128xf32>
    tpu.vector_store %arg10[%c0_8, %c0_9, %c0_10], %11 {strides = array<i32>} : memref<8x8x128xf32, #tpu.memory_space<vmem>>, vector<8x8x128xf32>,
    %cst_11 = arith.constant 0.000000e+00 : f32
    %13 = vector.broadcast %cst_11 : f32 to vector<8x32xf32>
    %c0_i32 = arith.constant 0 : i32
    %14 = arith.index_cast %c0_i32 : i32 to index
    %c0_12 = arith.constant 0 : index
    %c0_13 = arith.constant 0 : index
    %15 = vector.load %arg10[%14, %c0_12, %c0_13] : memref<8x8x128xf32, #tpu.memory_space<vmem>>, vector<1x8x128xf32>
    %16 = vector.shape_cast %15 : vector<1x8x128xf32> to vector<8x128xf32>
    %cst_14 = arith.constant dense<0.000000e+00> : vector<8x128xf32>
    %17 = tpu.matmul %13, %4, %cst_14 {dimension_numbers = #tpu.dot_dimension_numbers<[1], [0], [0], [1], [0, 0, 1, 1], [], []>} : vector<8x32xf32>, vector<32x128xf32>, vector<8x128xf32> -> vector<8x128xf32>
    %18 = arith.addf %16, %17 : vector<8x128xf32>
    %19 = arith.negf %18 : vector<8x128xf32>
    %20 = math.exp %19 : vector<8x128xf32>
    %cst_15 = arith.constant 1.000000e+00 : f32
    %21 = vector.broadcast %cst_15 : f32 to vector<8x128xf32>
    %22 = arith.addf %21, %20 : vector<8x128xf32>
    %23 = arith.divf %21, %22 : vector<8x128xf32>
    %24 = math.tanh %18 : vector<8x128xf32>
    %25 = arith.select %2, %23, %24 : vector<8x128xi1>, vector<8x128xf32>
    %26 = vector.extract_strided_slice %25 {offsets = [0, 0], sizes = [8, 32], strides = [1, 1]} : vector<8x128xf32> to vector<8x32xf32>
    %27 = vector.extract_strided_slice %25 {offsets = [0, 32], sizes = [8, 32], strides = [1, 1]} : vector<8x128xf32> to vector<8x32xf32>
    %28 = vector.extract_strided_slice %25 {offsets = [0, 64], sizes = [8, 32], strides = [1, 1]} : vector<8x128xf32> to vector<8x32xf32>
    %29 = vector.extract_strided_slice %25 {offsets = [0, 96], sizes = [8, 32], strides = [1, 1]} : vector<8x128xf32> to vector<8x32xf32>
    %30 = arith.mulf %27, %13 : vector<8x32xf32>
    %31 = arith.mulf %26, %29 : vector<8x32xf32>
    %32 = arith.addf %30, %31 : vector<8x32xf32>
    %33 = math.tanh %32 : vector<8x32xf32>
    %34 = arith.mulf %28, %33 : vector<8x32xf32>
    %35 = arith.truncf %34 : vector<8x32xf32> to vector<8x32xbf16>
    %36 = arith.index_cast %c0_i32 : i32 to index
    %c0_16 = arith.constant 0 : index
    %c0_17 = arith.constant 0 : index
    %37 = vector.load %arg11[%36, %c0_16, %c0_17] : memref<8x8x32xbf16, #tpu.memory_space<vmem>>, vector<1x8x32xbf16>
    %38 = vector.shape_cast %37 : vector<1x8x32xbf16> to vector<8x32xbf16>
    %39 = vector.shape_cast %35 : vector<8x32xbf16> to vector<1x8x32xbf16>
    tpu.vector_store %arg11[%36, %c0_16, %c0_17], %39 {strides = array<i32>} : memref<8x8x32xbf16, #tpu.memory_space<vmem>>, vector<1x8x32xbf16>,
    %c1_i32 = arith.constant 1 : i32
    %40 = arith.index_cast %c1_i32 : i32 to index
    %c0_18 = arith.constant 0 : index
    %c0_19 = arith.constant 0 : index
    %41 = vector.load %arg10[%40, %c0_18, %c0_19] : memref<8x8x128xf32, #tpu.memory_space<vmem>>, vector<1x8x128xf32>
    %42 = vector.shape_cast %41 : vector<1x8x128xf32> to vector<8x128xf32>
    %cst_20 = arith.constant dense<0.000000e+00> : vector<8x128xf32>
    %43 = tpu.matmul %34, %4, %cst_20 {dimension_numbers = #tpu.dot_dimension_numbers<[1], [0], [0], [1], [0, 0, 1, 1], [], []>} : vector<8x32xf32>, vector<32x128xf32>, vector<8x128xf32> -> vector<8x128xf32>
    %44 = arith.addf %42, %43 : vector<8x128xf32>
    %45 = arith.negf %44 : vector<8x128xf32>
    %46 = math.exp %45 : vector<8x128xf32>
    %cst_21 = arith.constant 1.000000e+00 : f32
    %47 = vector.broadcast %cst_21 : f32 to vector<8x128xf32>
    %48 = arith.addf %47, %46 : vector<8x128xf32>
    %49 = arith.divf %47, %48 : vector<8x128xf32>
    %50 = math.tanh %44 : vector<8x128xf32>
    %51 = arith.select %2, %49, %50 : vector<8x128xi1>, vector<8x128xf32>
    %52 = vector.extract_strided_slice %51 {offsets = [0, 0], sizes = [8, 32], strides = [1, 1]} : vector<8x128xf32> to vector<8x32xf32>
    %53 = vector.extract_strided_slice %51 {offsets = [0, 32], sizes = [8, 32], strides = [1, 1]} : vector<8x128xf32> to vector<8x32xf32>
    %54 = vector.extract_strided_slice %51 {offsets = [0, 64], sizes = [8, 32], strides = [1, 1]} : vector<8x128xf32> to vector<8x32xf32>
    %55 = vector.extract_strided_slice %51 {offsets = [0, 96], sizes = [8, 32], strides = [1, 1]} : vector<8x128xf32> to vector<8x32xf32>
    %56 = arith.mulf %53, %32 : vector<8x32xf32>
    %57 = arith.mulf %52, %55 : vector<8x32xf32>
    %58 = arith.addf %56, %57 : vector<8x32xf32>
    %59 = math.tanh %58 : vector<8x32xf32>
    %60 = arith.mulf %54, %59 : vector<8x32xf32>
    %61 = arith.truncf %60 : vector<8x32xf32> to vector<8x32xbf16>
    %62 = arith.index_cast %c1_i32 : i32 to index
    %c0_22 = arith.constant 0 : index
    %c0_23 = arith.constant 0 : index
    %63 = vector.load %arg11[%62, %c0_22, %c0_23] : memref<8x8x32xbf16, #tpu.memory_space<vmem>>, vector<1x8x32xbf16>
    %64 = vector.shape_cast %63 : vector<1x8x32xbf16> to vector<8x32xbf16>
    %65 = vector.shape_cast %61 : vector<8x32xbf16> to vector<1x8x32xbf16>
    tpu.vector_store %arg11[%62, %c0_22, %c0_23], %65 {strides = array<i32>} : memref<8x8x32xbf16, #tpu.memory_space<vmem>>, vector<1x8x32xbf16>,
    %c2_i32 = arith.constant 2 : i32
    %66 = arith.index_cast %c2_i32 : i32 to index
    %c0_24 = arith.constant 0 : index
    %c0_25 = arith.constant 0 : index
    %67 = vector.load %arg10[%66, %c0_24, %c0_25] : memref<8x8x128xf32, #tpu.memory_space<vmem>>, vector<1x8x128xf32>
    %68 = vector.shape_cast %67 : vector<1x8x128xf32> to vector<8x128xf32>
    %cst_26 = arith.constant dense<0.000000e+00> : vector<8x128xf32>
    %69 = tpu.matmul %60, %4, %cst_26 {dimension_numbers = #tpu.dot_dimension_numbers<[1], [0], [0], [1], [0, 0, 1, 1], [], []>} : vector<8x32xf32>, vector<32x128xf32>, vector<8x128xf32> -> vector<8x128xf32>
    %70 = arith.addf %68, %69 : vector<8x128xf32>
    %71 = arith.negf %70 : vector<8x128xf32>
    %72 = math.exp %71 : vector<8x128xf32>
    %cst_27 = arith.constant 1.000000e+00 : f32
    %73 = vector.broadcast %cst_27 : f32 to vector<8x128xf32>
    %74 = arith.addf %73, %72 : vector<8x128xf32>
    %75 = arith.divf %73, %74 : vector<8x128xf32>
    %76 = math.tanh %70 : vector<8x128xf32>
    %77 = arith.select %2, %75, %76 : vector<8x128xi1>, vector<8x128xf32>
    %78 = vector.extract_strided_slice %77 {offsets = [0, 0], sizes = [8, 32], strides = [1, 1]} : vector<8x128xf32> to vector<8x32xf32>
    %79 = vector.extract_strided_slice %77 {offsets = [0, 32], sizes = [8, 32], strides = [1, 1]} : vector<8x128xf32> to vector<8x32xf32>
    %80 = vector.extract_strided_slice %77 {offsets = [0, 64], sizes = [8, 32], strides = [1, 1]} : vector<8x128xf32> to vector<8x32xf32>
    %81 = vector.extract_strided_slice %77 {offsets = [0, 96], sizes = [8, 32], strides = [1, 1]} : vector<8x128xf32> to vector<8x32xf32>
    %82 = arith.mulf %79, %58 : vector<8x32xf32>
    %83 = arith.mulf %78, %81 : vector<8x32xf32>
    %84 = arith.addf %82, %83 : vector<8x32xf32>
    %85 = math.tanh %84 : vector<8x32xf32>
    %86 = arith.mulf %80, %85 : vector<8x32xf32>
    %87 = arith.truncf %86 : vector<8x32xf32> to vector<8x32xbf16>
    %88 = arith.index_cast %c2_i32 : i32 to index
    %c0_28 = arith.constant 0 : index
    %c0_29 = arith.constant 0 : index
    %89 = vector.load %arg11[%88, %c0_28, %c0_29] : memref<8x8x32xbf16, #tpu.memory_space<vmem>>, vector<1x8x32xbf16>
    %90 = vector.shape_cast %89 : vector<1x8x32xbf16> to vector<8x32xbf16>
    %91 = vector.shape_cast %87 : vector<8x32xbf16> to vector<1x8x32xbf16>
    tpu.vector_store %arg11[%88, %c0_28, %c0_29], %91 {strides = array<i32>} : memref<8x8x32xbf16, #tpu.memory_space<vmem>>, vector<1x8x32xbf16>,
    %c3_i32 = arith.constant 3 : i32
    %92 = arith.index_cast %c3_i32 : i32 to index
    %c0_30 = arith.constant 0 : index
    %c0_31 = arith.constant 0 : index
    %93 = vector.load %arg10[%92, %c0_30, %c0_31] : memref<8x8x128xf32, #tpu.memory_space<vmem>>, vector<1x8x128xf32>
    %94 = vector.shape_cast %93 : vector<1x8x128xf32> to vector<8x128xf32>
    %cst_32 = arith.constant dense<0.000000e+00> : vector<8x128xf32>
    %95 = tpu.matmul %86, %4, %cst_32 {dimension_numbers = #tpu.dot_dimension_numbers<[1], [0], [0], [1], [0, 0, 1, 1], [], []>} : vector<8x32xf32>, vector<32x128xf32>, vector<8x128xf32> -> vector<8x128xf32>
    %96 = arith.addf %94, %95 : vector<8x128xf32>
    %97 = arith.negf %96 : vector<8x128xf32>
    %98 = math.exp %97 : vector<8x128xf32>
    %cst_33 = arith.constant 1.000000e+00 : f32
    %99 = vector.broadcast %cst_33 : f32 to vector<8x128xf32>
    %100 = arith.addf %99, %98 : vector<8x128xf32>
    %101 = arith.divf %99, %100 : vector<8x128xf32>
    %102 = math.tanh %96 : vector<8x128xf32>
    %103 = arith.select %2, %101, %102 : vector<8x128xi1>, vector<8x128xf32>
    %104 = vector.extract_strided_slice %103 {offsets = [0, 0], sizes = [8, 32], strides = [1, 1]} : vector<8x128xf32> to vector<8x32xf32>
    %105 = vector.extract_strided_slice %103 {offsets = [0, 32], sizes = [8, 32], strides = [1, 1]} : vector<8x128xf32> to vector<8x32xf32>
    %106 = vector.extract_strided_slice %103 {offsets = [0, 64], sizes = [8, 32], strides = [1, 1]} : vector<8x128xf32> to vector<8x32xf32>
    %107 = vector.extract_strided_slice %103 {offsets = [0, 96], sizes = [8, 32], strides = [1, 1]} : vector<8x128xf32> to vector<8x32xf32>
    %108 = arith.mulf %105, %84 : vector<8x32xf32>
    %109 = arith.mulf %104, %107 : vector<8x32xf32>
    %110 = arith.addf %108, %109 : vector<8x32xf32>
    %111 = math.tanh %110 : vector<8x32xf32>
    %112 = arith.mulf %106, %111 : vector<8x32xf32>
    %113 = arith.truncf %112 : vector<8x32xf32> to vector<8x32xbf16>
    %114 = arith.index_cast %c3_i32 : i32 to index
    %c0_34 = arith.constant 0 : index
    %c0_35 = arith.constant 0 : index
    %115 = vector.load %arg11[%114, %c0_34, %c0_35] : memref<8x8x32xbf16, #tpu.memory_space<vmem>>, vector<1x8x32xbf16>
    %116 = vector.shape_cast %115 : vector<1x8x32xbf16> to vector<8x32xbf16>
    %117 = vector.shape_cast %113 : vector<8x32xbf16> to vector<1x8x32xbf16>
    tpu.vector_store %arg11[%114, %c0_34, %c0_35], %117 {strides = array<i32>} : memref<8x8x32xbf16, #tpu.memory_space<vmem>>, vector<1x8x32xbf16>,
    %c4_i32 = arith.constant 4 : i32
    %118 = arith.index_cast %c4_i32 : i32 to index
    %c0_36 = arith.constant 0 : index
    %c0_37 = arith.constant 0 : index
    %119 = vector.load %arg10[%118, %c0_36, %c0_37] : memref<8x8x128xf32, #tpu.memory_space<vmem>>, vector<1x8x128xf32>
    %120 = vector.shape_cast %119 : vector<1x8x128xf32> to vector<8x128xf32>
    %cst_38 = arith.constant dense<0.000000e+00> : vector<8x128xf32>
    %121 = tpu.matmul %112, %4, %cst_38 {dimension_numbers = #tpu.dot_dimension_numbers<[1], [0], [0], [1], [0, 0, 1, 1], [], []>} : vector<8x32xf32>, vector<32x128xf32>, vector<8x128xf32> -> vector<8x128xf32>
    %122 = arith.addf %120, %121 : vector<8x128xf32>
    %123 = arith.negf %122 : vector<8x128xf32>
    %124 = math.exp %123 : vector<8x128xf32>
    %cst_39 = arith.constant 1.000000e+00 : f32
    %125 = vector.broadcast %cst_39 : f32 to vector<8x128xf32>
    %126 = arith.addf %125, %124 : vector<8x128xf32>
    %127 = arith.divf %125, %126 : vector<8x128xf32>
    %128 = math.tanh %122 : vector<8x128xf32>
    %129 = arith.select %2, %127, %128 : vector<8x128xi1>, vector<8x128xf32>
    %130 = vector.extract_strided_slice %129 {offsets = [0, 0], sizes = [8, 32], strides = [1, 1]} : vector<8x128xf32> to vector<8x32xf32>
    %131 = vector.extract_strided_slice %129 {offsets = [0, 32], sizes = [8, 32], strides = [1, 1]} : vector<8x128xf32> to vector<8x32xf32>
    %132 = vector.extract_strided_slice %129 {offsets = [0, 64], sizes = [8, 32], strides = [1, 1]} : vector<8x128xf32> to vector<8x32xf32>
    %133 = vector.extract_strided_slice %129 {offsets = [0, 96], sizes = [8, 32], strides = [1, 1]} : vector<8x128xf32> to vector<8x32xf32>
    %134 = arith.mulf %131, %110 : vector<8x32xf32>
    %135 = arith.mulf %130, %133 : vector<8x32xf32>
    %136 = arith.addf %134, %135 : vector<8x32xf32>
    %137 = math.tanh %136 : vector<8x32xf32>
    %138 = arith.mulf %132, %137 : vector<8x32xf32>
    %139 = arith.truncf %138 : vector<8x32xf32> to vector<8x32xbf16>
    %140 = arith.index_cast %c4_i32 : i32 to index
    %c0_40 = arith.constant 0 : index
    %c0_41 = arith.constant 0 : index
    %141 = vector.load %arg11[%140, %c0_40, %c0_41] : memref<8x8x32xbf16, #tpu.memory_space<vmem>>, vector<1x8x32xbf16>
    %142 = vector.shape_cast %141 : vector<1x8x32xbf16> to vector<8x32xbf16>
    %143 = vector.shape_cast %139 : vector<8x32xbf16> to vector<1x8x32xbf16>
    tpu.vector_store %arg11[%140, %c0_40, %c0_41], %143 {strides = array<i32>} : memref<8x8x32xbf16, #tpu.memory_space<vmem>>, vector<1x8x32xbf16>,
    %c5_i32 = arith.constant 5 : i32
    %144 = arith.index_cast %c5_i32 : i32 to index
    %c0_42 = arith.constant 0 : index
    %c0_43 = arith.constant 0 : index
    %145 = vector.load %arg10[%144, %c0_42, %c0_43] : memref<8x8x128xf32, #tpu.memory_space<vmem>>, vector<1x8x128xf32>
    %146 = vector.shape_cast %145 : vector<1x8x128xf32> to vector<8x128xf32>
    %cst_44 = arith.constant dense<0.000000e+00> : vector<8x128xf32>
    %147 = tpu.matmul %138, %4, %cst_44 {dimension_numbers = #tpu.dot_dimension_numbers<[1], [0], [0], [1], [0, 0, 1, 1], [], []>} : vector<8x32xf32>, vector<32x128xf32>, vector<8x128xf32> -> vector<8x128xf32>
    %148 = arith.addf %146, %147 : vector<8x128xf32>
    %149 = arith.negf %148 : vector<8x128xf32>
    %150 = math.exp %149 : vector<8x128xf32>
    %cst_45 = arith.constant 1.000000e+00 : f32
    %151 = vector.broadcast %cst_45 : f32 to vector<8x128xf32>
    %152 = arith.addf %151, %150 : vector<8x128xf32>
    %153 = arith.divf %151, %152 : vector<8x128xf32>
    %154 = math.tanh %148 : vector<8x128xf32>
    %155 = arith.select %2, %153, %154 : vector<8x128xi1>, vector<8x128xf32>
    %156 = vector.extract_strided_slice %155 {offsets = [0, 0], sizes = [8, 32], strides = [1, 1]} : vector<8x128xf32> to vector<8x32xf32>
    %157 = vector.extract_strided_slice %155 {offsets = [0, 32], sizes = [8, 32], strides = [1, 1]} : vector<8x128xf32> to vector<8x32xf32>
    %158 = vector.extract_strided_slice %155 {offsets = [0, 64], sizes = [8, 32], strides = [1, 1]} : vector<8x128xf32> to vector<8x32xf32>
    %159 = vector.extract_strided_slice %155 {offsets = [0, 96], sizes = [8, 32], strides = [1, 1]} : vector<8x128xf32> to vector<8x32xf32>
    %160 = arith.mulf %157, %136 : vector<8x32xf32>
    %161 = arith.mulf %156, %159 : vector<8x32xf32>
    %162 = arith.addf %160, %161 : vector<8x32xf32>
    %163 = math.tanh %162 : vector<8x32xf32>
    %164 = arith.mulf %158, %163 : vector<8x32xf32>
    %165 = arith.truncf %164 : vector<8x32xf32> to vector<8x32xbf16>
    %166 = arith.index_cast %c5_i32 : i32 to index
    %c0_46 = arith.constant 0 : index
    %c0_47 = arith.constant 0 : index
    %167 = vector.load %arg11[%166, %c0_46, %c0_47] : memref<8x8x32xbf16, #tpu.memory_space<vmem>>, vector<1x8x32xbf16>
    %168 = vector.shape_cast %167 : vector<1x8x32xbf16> to vector<8x32xbf16>
    %169 = vector.shape_cast %165 : vector<8x32xbf16> to vector<1x8x32xbf16>
    tpu.vector_store %arg11[%166, %c0_46, %c0_47], %169 {strides = array<i32>} : memref<8x8x32xbf16, #tpu.memory_space<vmem>>, vector<1x8x32xbf16>,
    %c6_i32 = arith.constant 6 : i32
    %170 = arith.index_cast %c6_i32 : i32 to index
    %c0_48 = arith.constant 0 : index
    %c0_49 = arith.constant 0 : index
    %171 = vector.load %arg10[%170, %c0_48, %c0_49] : memref<8x8x128xf32, #tpu.memory_space<vmem>>, vector<1x8x128xf32>
    %172 = vector.shape_cast %171 : vector<1x8x128xf32> to vector<8x128xf32>
    %cst_50 = arith.constant dense<0.000000e+00> : vector<8x128xf32>
    %173 = tpu.matmul %164, %4, %cst_50 {dimension_numbers = #tpu.dot_dimension_numbers<[1], [0], [0], [1], [0, 0, 1, 1], [], []>} : vector<8x32xf32>, vector<32x128xf32>, vector<8x128xf32> -> vector<8x128xf32>
    %174 = arith.addf %172, %173 : vector<8x128xf32>
    %175 = arith.negf %174 : vector<8x128xf32>
    %176 = math.exp %175 : vector<8x128xf32>
    %cst_51 = arith.constant 1.000000e+00 : f32
    %177 = vector.broadcast %cst_51 : f32 to vector<8x128xf32>
    %178 = arith.addf %177, %176 : vector<8x128xf32>
    %179 = arith.divf %177, %178 : vector<8x128xf32>
    %180 = math.tanh %174 : vector<8x128xf32>
    %181 = arith.select %2, %179, %180 : vector<8x128xi1>, vector<8x128xf32>
    %182 = vector.extract_strided_slice %181 {offsets = [0, 0], sizes = [8, 32], strides = [1, 1]} : vector<8x128xf32> to vector<8x32xf32>
    %183 = vector.extract_strided_slice %181 {offsets = [0, 32], sizes = [8, 32], strides = [1, 1]} : vector<8x128xf32> to vector<8x32xf32>
    %184 = vector.extract_strided_slice %181 {offsets = [0, 64], sizes = [8, 32], strides = [1, 1]} : vector<8x128xf32> to vector<8x32xf32>
    %185 = vector.extract_strided_slice %181 {offsets = [0, 96], sizes = [8, 32], strides = [1, 1]} : vector<8x128xf32> to vector<8x32xf32>
    %186 = arith.mulf %183, %162 : vector<8x32xf32>
    %187 = arith.mulf %182, %185 : vector<8x32xf32>
    %188 = arith.addf %186, %187 : vector<8x32xf32>
    %189 = math.tanh %188 : vector<8x32xf32>
    %190 = arith.mulf %184, %189 : vector<8x32xf32>
    %191 = arith.truncf %190 : vector<8x32xf32> to vector<8x32xbf16>
    %192 = arith.index_cast %c6_i32 : i32 to index
    %c0_52 = arith.constant 0 : index
    %c0_53 = arith.constant 0 : index
    %193 = vector.load %arg11[%192, %c0_52, %c0_53] : memref<8x8x32xbf16, #tpu.memory_space<vmem>>, vector<1x8x32xbf16>
    %194 = vector.shape_cast %193 : vector<1x8x32xbf16> to vector<8x32xbf16>
    %195 = vector.shape_cast %191 : vector<8x32xbf16> to vector<1x8x32xbf16>
    tpu.vector_store %arg11[%192, %c0_52, %c0_53], %195 {strides = array<i32>} : memref<8x8x32xbf16, #tpu.memory_space<vmem>>, vector<1x8x32xbf16>,
    %c7_i32 = arith.constant 7 : i32
    %196 = arith.index_cast %c7_i32 : i32 to index
    %c0_54 = arith.constant 0 : index
    %c0_55 = arith.constant 0 : index
    %197 = vector.load %arg10[%196, %c0_54, %c0_55] : memref<8x8x128xf32, #tpu.memory_space<vmem>>, vector<1x8x128xf32>
    %198 = vector.shape_cast %197 : vector<1x8x128xf32> to vector<8x128xf32>
    %cst_56 = arith.constant dense<0.000000e+00> : vector<8x128xf32>
    %199 = tpu.matmul %190, %4, %cst_56 {dimension_numbers = #tpu.dot_dimension_numbers<[1], [0], [0], [1], [0, 0, 1, 1], [], []>} : vector<8x32xf32>, vector<32x128xf32>, vector<8x128xf32> -> vector<8x128xf32>
    %200 = arith.addf %198, %199 : vector<8x128xf32>
    %201 = arith.negf %200 : vector<8x128xf32>
    %202 = math.exp %201 : vector<8x128xf32>
    %cst_57 = arith.constant 1.000000e+00 : f32
    %203 = vector.broadcast %cst_57 : f32 to vector<8x128xf32>
    %204 = arith.addf %203, %202 : vector<8x128xf32>
    %205 = arith.divf %203, %204 : vector<8x128xf32>
    %206 = math.tanh %200 : vector<8x128xf32>
    %207 = arith.select %2, %205, %206 : vector<8x128xi1>, vector<8x128xf32>
    %208 = vector.extract_strided_slice %207 {offsets = [0, 0], sizes = [8, 32], strides = [1, 1]} : vector<8x128xf32> to vector<8x32xf32>
    %209 = vector.extract_strided_slice %207 {offsets = [0, 32], sizes = [8, 32], strides = [1, 1]} : vector<8x128xf32> to vector<8x32xf32>
    %210 = vector.extract_strided_slice %207 {offsets = [0, 64], sizes = [8, 32], strides = [1, 1]} : vector<8x128xf32> to vector<8x32xf32>
    %211 = vector.extract_strided_slice %207 {offsets = [0, 96], sizes = [8, 32], strides = [1, 1]} : vector<8x128xf32> to vector<8x32xf32>
    %212 = arith.mulf %209, %188 : vector<8x32xf32>
    %213 = arith.mulf %208, %211 : vector<8x32xf32>
    %214 = arith.addf %212, %213 : vector<8x32xf32>
    %215 = math.tanh %214 : vector<8x32xf32>
    %216 = arith.mulf %210, %215 : vector<8x32xf32>
    %217 = arith.truncf %216 : vector<8x32xf32> to vector<8x32xbf16>
    %218 = arith.index_cast %c7_i32 : i32 to index
    %c0_58 = arith.constant 0 : index
    %c0_59 = arith.constant 0 : index
    %219 = vector.load %arg11[%218, %c0_58, %c0_59] : memref<8x8x32xbf16, #tpu.memory_space<vmem>>, vector<1x8x32xbf16>
    %220 = vector.shape_cast %219 : vector<1x8x32xbf16> to vector<8x32xbf16>
    %221 = vector.shape_cast %217 : vector<8x32xbf16> to vector<1x8x32xbf16>
    tpu.vector_store %arg11[%218, %c0_58, %c0_59], %221 {strides = array<i32>} : memref<8x8x32xbf16, #tpu.memory_space<vmem>>, vector<1x8x32xbf16>,
    %c8_i32 = arith.constant 8 : i32
    %c0_60 = arith.constant 0 : index
    %c0_61 = arith.constant 0 : index
    %c0_62 = arith.constant 0 : index
    %222 = vector.load %arg8[%c0_60, %c0_61, %c0_62] : memref<2x8x32xf32, #tpu.memory_space<vmem>>, vector<1x8x32xf32>
    %223 = vector.shape_cast %222 : vector<1x8x32xf32> to vector<8x32xf32>
    %224 = vector.shape_cast %216 : vector<8x32xf32> to vector<1x8x32xf32>
    tpu.vector_store %arg8[%c0_60, %c0_61, %c0_62], %224 {strides = array<i32>} : memref<2x8x32xf32, #tpu.memory_space<vmem>>, vector<1x8x32xf32>,
    %c0_63 = arith.constant 0 : index
    %c0_64 = arith.constant 0 : index
    %c0_65 = arith.constant 0 : index
    %225 = vector.load %arg9[%c0_63, %c0_64, %c0_65] : memref<2x8x32xf32, #tpu.memory_space<vmem>>, vector<1x8x32xf32>
    %226 = vector.shape_cast %225 : vector<1x8x32xf32> to vector<8x32xf32>
    %227 = vector.shape_cast %214 : vector<8x32xf32> to vector<1x8x32xf32>
    tpu.vector_store %arg9[%c0_63, %c0_64, %c0_65], %227 {strides = array<i32>} : memref<2x8x32xf32, #tpu.memory_space<vmem>>, vector<1x8x32xf32>,
    %c0_66 = arith.constant 0 : index
    %c0_67 = arith.constant 0 : index
    %228 = vector.load %arg5[%c0_66, %c0_67] : memref<32x128xbf16, #tpu.memory_space<vmem>>, vector<32x128xbf16>
    %c0_68 = arith.constant 0 : index
    %c0_69 = arith.constant 0 : index
    %229 = vector.load %arg6[%c0_68, %c0_69] : memref<32x128xf32, #tpu.memory_space<vmem>>, vector<32x128xf32>
    %c0_70 = arith.constant 0 : index
    %c0_71 = arith.constant 0 : index
    %230 = vector.load %arg7[%c0_70, %c0_71] : memref<1x128xf32, #tpu.memory_space<vmem>>, vector<1x128xf32>
    %c0_72 = arith.constant 0 : index
    %c0_73 = arith.constant 0 : index
    %c0_74 = arith.constant 0 : index
    %231 = vector.load %arg11[%c0_72, %c0_73, %c0_74] : memref<8x8x32xbf16, #tpu.memory_space<vmem>>, vector<8x8x32xbf16>
    %232 = vector.shape_cast %231 : vector<8x8x32xbf16> to vector<64x32xbf16>
    %cst_75 = arith.constant dense<0.000000e+00> : vector<64x128xf32>
    %233 = tpu.matmul %232, %228, %cst_75 {dimension_numbers = #tpu.dot_dimension_numbers<[1], [0], [0], [1], [0, 0, 1, 1], [], []>} : vector<64x32xbf16>, vector<32x128xbf16>, vector<64x128xf32> -> vector<64x128xf32>
    %234 = vector.broadcast %230 : vector<1x128xf32> to vector<64x128xf32>
    %235 = arith.addf %233, %234 : vector<64x128xf32>
    %236 = vector.shape_cast %235 : vector<64x128xf32> to vector<8x8x128xf32>
    %c0_76 = arith.constant 0 : index
    %c0_77 = arith.constant 0 : index
    %c0_78 = arith.constant 0 : index
    %237 = vector.load %arg10[%c0_76, %c0_77, %c0_78] : memref<8x8x128xf32, #tpu.memory_space<vmem>>, vector<8x8x128xf32>
    tpu.vector_store %arg10[%c0_76, %c0_77, %c0_78], %236 {strides = array<i32>} : memref<8x8x128xf32, #tpu.memory_space<vmem>>, vector<8x8x128xf32>,
    %cst_79 = arith.constant 0.000000e+00 : f32
    %238 = vector.broadcast %cst_79 : f32 to vector<8x32xf32>
    %c0_i32_80 = arith.constant 0 : i32
    %239 = arith.index_cast %c0_i32_80 : i32 to index
    %c0_81 = arith.constant 0 : index
    %c0_82 = arith.constant 0 : index
    %240 = vector.load %arg10[%239, %c0_81, %c0_82] : memref<8x8x128xf32, #tpu.memory_space<vmem>>, vector<1x8x128xf32>
    %241 = vector.shape_cast %240 : vector<1x8x128xf32> to vector<8x128xf32>
    %cst_83 = arith.constant dense<0.000000e+00> : vector<8x128xf32>
    %242 = tpu.matmul %238, %229, %cst_83 {dimension_numbers = #tpu.dot_dimension_numbers<[1], [0], [0], [1], [0, 0, 1, 1], [], []>} : vector<8x32xf32>, vector<32x128xf32>, vector<8x128xf32> -> vector<8x128xf32>
    %243 = arith.addf %241, %242 : vector<8x128xf32>
    %244 = arith.negf %243 : vector<8x128xf32>
    %245 = math.exp %244 : vector<8x128xf32>
    %cst_84 = arith.constant 1.000000e+00 : f32
    %246 = vector.broadcast %cst_84 : f32 to vector<8x128xf32>
    %247 = arith.addf %246, %245 : vector<8x128xf32>
    %248 = arith.divf %246, %247 : vector<8x128xf32>
    %249 = math.tanh %243 : vector<8x128xf32>
    %250 = arith.select %2, %248, %249 : vector<8x128xi1>, vector<8x128xf32>
    %251 = vector.extract_strided_slice %250 {offsets = [0, 0], sizes = [8, 32], strides = [1, 1]} : vector<8x128xf32> to vector<8x32xf32>
    %252 = vector.extract_strided_slice %250 {offsets = [0, 32], sizes = [8, 32], strides = [1, 1]} : vector<8x128xf32> to vector<8x32xf32>
    %253 = vector.extract_strided_slice %250 {offsets = [0, 64], sizes = [8, 32], strides = [1, 1]} : vector<8x128xf32> to vector<8x32xf32>
    %254 = vector.extract_strided_slice %250 {offsets = [0, 96], sizes = [8, 32], strides = [1, 1]} : vector<8x128xf32> to vector<8x32xf32>
    %255 = arith.mulf %252, %238 : vector<8x32xf32>
    %256 = arith.mulf %251, %254 : vector<8x32xf32>
    %257 = arith.addf %255, %256 : vector<8x32xf32>
    %258 = math.tanh %257 : vector<8x32xf32>
    %259 = arith.mulf %253, %258 : vector<8x32xf32>
    %c1_i32_85 = arith.constant 1 : i32
    %260 = arith.index_cast %c1_i32_85 : i32 to index
    %c0_86 = arith.constant 0 : index
    %c0_87 = arith.constant 0 : index
    %261 = vector.load %arg10[%260, %c0_86, %c0_87] : memref<8x8x128xf32, #tpu.memory_space<vmem>>, vector<1x8x128xf32>
    %262 = vector.shape_cast %261 : vector<1x8x128xf32> to vector<8x128xf32>
    %cst_88 = arith.constant dense<0.000000e+00> : vector<8x128xf32>
    %263 = tpu.matmul %259, %229, %cst_88 {dimension_numbers = #tpu.dot_dimension_numbers<[1], [0], [0], [1], [0, 0, 1, 1], [], []>} : vector<8x32xf32>, vector<32x128xf32>, vector<8x128xf32> -> vector<8x128xf32>
    %264 = arith.addf %262, %263 : vector<8x128xf32>
    %265 = arith.negf %264 : vector<8x128xf32>
    %266 = math.exp %265 : vector<8x128xf32>
    %cst_89 = arith.constant 1.000000e+00 : f32
    %267 = vector.broadcast %cst_89 : f32 to vector<8x128xf32>
    %268 = arith.addf %267, %266 : vector<8x128xf32>
    %269 = arith.divf %267, %268 : vector<8x128xf32>
    %270 = math.tanh %264 : vector<8x128xf32>
    %271 = arith.select %2, %269, %270 : vector<8x128xi1>, vector<8x128xf32>
    %272 = vector.extract_strided_slice %271 {offsets = [0, 0], sizes = [8, 32], strides = [1, 1]} : vector<8x128xf32> to vector<8x32xf32>
    %273 = vector.extract_strided_slice %271 {offsets = [0, 32], sizes = [8, 32], strides = [1, 1]} : vector<8x128xf32> to vector<8x32xf32>
    %274 = vector.extract_strided_slice %271 {offsets = [0, 64], sizes = [8, 32], strides = [1, 1]} : vector<8x128xf32> to vector<8x32xf32>
    %275 = vector.extract_strided_slice %271 {offsets = [0, 96], sizes = [8, 32], strides = [1, 1]} : vector<8x128xf32> to vector<8x32xf32>
    %276 = arith.mulf %273, %257 : vector<8x32xf32>
    %277 = arith.mulf %272, %275 : vector<8x32xf32>
    %278 = arith.addf %276, %277 : vector<8x32xf32>
    %279 = math.tanh %278 : vector<8x32xf32>
    %280 = arith.mulf %274, %279 : vector<8x32xf32>
    %c2_i32_90 = arith.constant 2 : i32
    %281 = arith.index_cast %c2_i32_90 : i32 to index
    %c0_91 = arith.constant 0 : index
    %c0_92 = arith.constant 0 : index
    %282 = vector.load %arg10[%281, %c0_91, %c0_92] : memref<8x8x128xf32, #tpu.memory_space<vmem>>, vector<1x8x128xf32>
    %283 = vector.shape_cast %282 : vector<1x8x128xf32> to vector<8x128xf32>
    %cst_93 = arith.constant dense<0.000000e+00> : vector<8x128xf32>
    %284 = tpu.matmul %280, %229, %cst_93 {dimension_numbers = #tpu.dot_dimension_numbers<[1], [0], [0], [1], [0, 0, 1, 1], [], []>} : vector<8x32xf32>, vector<32x128xf32>, vector<8x128xf32> -> vector<8x128xf32>
    %285 = arith.addf %283, %284 : vector<8x128xf32>
    %286 = arith.negf %285 : vector<8x128xf32>
    %287 = math.exp %286 : vector<8x128xf32>
    %cst_94 = arith.constant 1.000000e+00 : f32
    %288 = vector.broadcast %cst_94 : f32 to vector<8x128xf32>
    %289 = arith.addf %288, %287 : vector<8x128xf32>
    %290 = arith.divf %288, %289 : vector<8x128xf32>
    %291 = math.tanh %285 : vector<8x128xf32>
    %292 = arith.select %2, %290, %291 : vector<8x128xi1>, vector<8x128xf32>
    %293 = vector.extract_strided_slice %292 {offsets = [0, 0], sizes = [8, 32], strides = [1, 1]} : vector<8x128xf32> to vector<8x32xf32>
    %294 = vector.extract_strided_slice %292 {offsets = [0, 32], sizes = [8, 32], strides = [1, 1]} : vector<8x128xf32> to vector<8x32xf32>
    %295 = vector.extract_strided_slice %292 {offsets = [0, 64], sizes = [8, 32], strides = [1, 1]} : vector<8x128xf32> to vector<8x32xf32>
    %296 = vector.extract_strided_slice %292 {offsets = [0, 96], sizes = [8, 32], strides = [1, 1]} : vector<8x128xf32> to vector<8x32xf32>
    %297 = arith.mulf %294, %278 : vector<8x32xf32>
    %298 = arith.mulf %293, %296 : vector<8x32xf32>
    %299 = arith.addf %297, %298 : vector<8x32xf32>
    %300 = math.tanh %299 : vector<8x32xf32>
    %301 = arith.mulf %295, %300 : vector<8x32xf32>
    %c3_i32_95 = arith.constant 3 : i32
    %302 = arith.index_cast %c3_i32_95 : i32 to index
    %c0_96 = arith.constant 0 : index
    %c0_97 = arith.constant 0 : index
    %303 = vector.load %arg10[%302, %c0_96, %c0_97] : memref<8x8x128xf32, #tpu.memory_space<vmem>>, vector<1x8x128xf32>
    %304 = vector.shape_cast %303 : vector<1x8x128xf32> to vector<8x128xf32>
    %cst_98 = arith.constant dense<0.000000e+00> : vector<8x128xf32>
    %305 = tpu.matmul %301, %229, %cst_98 {dimension_numbers = #tpu.dot_dimension_numbers<[1], [0], [0], [1], [0, 0, 1, 1], [], []>} : vector<8x32xf32>, vector<32x128xf32>, vector<8x128xf32> -> vector<8x128xf32>
    %306 = arith.addf %304, %305 : vector<8x128xf32>
    %307 = arith.negf %306 : vector<8x128xf32>
    %308 = math.exp %307 : vector<8x128xf32>
    %cst_99 = arith.constant 1.000000e+00 : f32
    %309 = vector.broadcast %cst_99 : f32 to vector<8x128xf32>
    %310 = arith.addf %309, %308 : vector<8x128xf32>
    %311 = arith.divf %309, %310 : vector<8x128xf32>
    %312 = math.tanh %306 : vector<8x128xf32>
    %313 = arith.select %2, %311, %312 : vector<8x128xi1>, vector<8x128xf32>
    %314 = vector.extract_strided_slice %313 {offsets = [0, 0], sizes = [8, 32], strides = [1, 1]} : vector<8x128xf32> to vector<8x32xf32>
    %315 = vector.extract_strided_slice %313 {offsets = [0, 32], sizes = [8, 32], strides = [1, 1]} : vector<8x128xf32> to vector<8x32xf32>
    %316 = vector.extract_strided_slice %313 {offsets = [0, 64], sizes = [8, 32], strides = [1, 1]} : vector<8x128xf32> to vector<8x32xf32>
    %317 = vector.extract_strided_slice %313 {offsets = [0, 96], sizes = [8, 32], strides = [1, 1]} : vector<8x128xf32> to vector<8x32xf32>
    %318 = arith.mulf %315, %299 : vector<8x32xf32>
    %319 = arith.mulf %314, %317 : vector<8x32xf32>
    %320 = arith.addf %318, %319 : vector<8x32xf32>
    %321 = math.tanh %320 : vector<8x32xf32>
    %322 = arith.mulf %316, %321 : vector<8x32xf32>
    %c4_i32_100 = arith.constant 4 : i32
    %323 = arith.index_cast %c4_i32_100 : i32 to index
    %c0_101 = arith.constant 0 : index
    %c0_102 = arith.constant 0 : index
    %324 = vector.load %arg10[%323, %c0_101, %c0_102] : memref<8x8x128xf32, #tpu.memory_space<vmem>>, vector<1x8x128xf32>
    %325 = vector.shape_cast %324 : vector<1x8x128xf32> to vector<8x128xf32>
    %cst_103 = arith.constant dense<0.000000e+00> : vector<8x128xf32>
    %326 = tpu.matmul %322, %229, %cst_103 {dimension_numbers = #tpu.dot_dimension_numbers<[1], [0], [0], [1], [0, 0, 1, 1], [], []>} : vector<8x32xf32>, vector<32x128xf32>, vector<8x128xf32> -> vector<8x128xf32>
    %327 = arith.addf %325, %326 : vector<8x128xf32>
    %328 = arith.negf %327 : vector<8x128xf32>
    %329 = math.exp %328 : vector<8x128xf32>
    %cst_104 = arith.constant 1.000000e+00 : f32
    %330 = vector.broadcast %cst_104 : f32 to vector<8x128xf32>
    %331 = arith.addf %330, %329 : vector<8x128xf32>
    %332 = arith.divf %330, %331 : vector<8x128xf32>
    %333 = math.tanh %327 : vector<8x128xf32>
    %334 = arith.select %2, %332, %333 : vector<8x128xi1>, vector<8x128xf32>
    %335 = vector.extract_strided_slice %334 {offsets = [0, 0], sizes = [8, 32], strides = [1, 1]} : vector<8x128xf32> to vector<8x32xf32>
    %336 = vector.extract_strided_slice %334 {offsets = [0, 32], sizes = [8, 32], strides = [1, 1]} : vector<8x128xf32> to vector<8x32xf32>
    %337 = vector.extract_strided_slice %334 {offsets = [0, 64], sizes = [8, 32], strides = [1, 1]} : vector<8x128xf32> to vector<8x32xf32>
    %338 = vector.extract_strided_slice %334 {offsets = [0, 96], sizes = [8, 32], strides = [1, 1]} : vector<8x128xf32> to vector<8x32xf32>
    %339 = arith.mulf %336, %320 : vector<8x32xf32>
    %340 = arith.mulf %335, %338 : vector<8x32xf32>
    %341 = arith.addf %339, %340 : vector<8x32xf32>
    %342 = math.tanh %341 : vector<8x32xf32>
    %343 = arith.mulf %337, %342 : vector<8x32xf32>
    %c5_i32_105 = arith.constant 5 : i32
    %344 = arith.index_cast %c5_i32_105 : i32 to index
    %c0_106 = arith.constant 0 : index
    %c0_107 = arith.constant 0 : index
    %345 = vector.load %arg10[%344, %c0_106, %c0_107] : memref<8x8x128xf32, #tpu.memory_space<vmem>>, vector<1x8x128xf32>
    %346 = vector.shape_cast %345 : vector<1x8x128xf32> to vector<8x128xf32>
    %cst_108 = arith.constant dense<0.000000e+00> : vector<8x128xf32>
    %347 = tpu.matmul %343, %229, %cst_108 {dimension_numbers = #tpu.dot_dimension_numbers<[1], [0], [0], [1], [0, 0, 1, 1], [], []>} : vector<8x32xf32>, vector<32x128xf32>, vector<8x128xf32> -> vector<8x128xf32>
    %348 = arith.addf %346, %347 : vector<8x128xf32>
    %349 = arith.negf %348 : vector<8x128xf32>
    %350 = math.exp %349 : vector<8x128xf32>
    %cst_109 = arith.constant 1.000000e+00 : f32
    %351 = vector.broadcast %cst_109 : f32 to vector<8x128xf32>
    %352 = arith.addf %351, %350 : vector<8x128xf32>
    %353 = arith.divf %351, %352 : vector<8x128xf32>
    %354 = math.tanh %348 : vector<8x128xf32>
    %355 = arith.select %2, %353, %354 : vector<8x128xi1>, vector<8x128xf32>
    %356 = vector.extract_strided_slice %355 {offsets = [0, 0], sizes = [8, 32], strides = [1, 1]} : vector<8x128xf32> to vector<8x32xf32>
    %357 = vector.extract_strided_slice %355 {offsets = [0, 32], sizes = [8, 32], strides = [1, 1]} : vector<8x128xf32> to vector<8x32xf32>
    %358 = vector.extract_strided_slice %355 {offsets = [0, 64], sizes = [8, 32], strides = [1, 1]} : vector<8x128xf32> to vector<8x32xf32>
    %359 = vector.extract_strided_slice %355 {offsets = [0, 96], sizes = [8, 32], strides = [1, 1]} : vector<8x128xf32> to vector<8x32xf32>
    %360 = arith.mulf %357, %341 : vector<8x32xf32>
    %361 = arith.mulf %356, %359 : vector<8x32xf32>
    %362 = arith.addf %360, %361 : vector<8x32xf32>
    %363 = math.tanh %362 : vector<8x32xf32>
    %364 = arith.mulf %358, %363 : vector<8x32xf32>
    %c6_i32_110 = arith.constant 6 : i32
    %365 = arith.index_cast %c6_i32_110 : i32 to index
    %c0_111 = arith.constant 0 : index
    %c0_112 = arith.constant 0 : index
    %366 = vector.load %arg10[%365, %c0_111, %c0_112] : memref<8x8x128xf32, #tpu.memory_space<vmem>>, vector<1x8x128xf32>
    %367 = vector.shape_cast %366 : vector<1x8x128xf32> to vector<8x128xf32>
    %cst_113 = arith.constant dense<0.000000e+00> : vector<8x128xf32>
    %368 = tpu.matmul %364, %229, %cst_113 {dimension_numbers = #tpu.dot_dimension_numbers<[1], [0], [0], [1], [0, 0, 1, 1], [], []>} : vector<8x32xf32>, vector<32x128xf32>, vector<8x128xf32> -> vector<8x128xf32>
    %369 = arith.addf %367, %368 : vector<8x128xf32>
    %370 = arith.negf %369 : vector<8x128xf32>
    %371 = math.exp %370 : vector<8x128xf32>
    %cst_114 = arith.constant 1.000000e+00 : f32
    %372 = vector.broadcast %cst_114 : f32 to vector<8x128xf32>
    %373 = arith.addf %372, %371 : vector<8x128xf32>
    %374 = arith.divf %372, %373 : vector<8x128xf32>
    %375 = math.tanh %369 : vector<8x128xf32>
    %376 = arith.select %2, %374, %375 : vector<8x128xi1>, vector<8x128xf32>
    %377 = vector.extract_strided_slice %376 {offsets = [0, 0], sizes = [8, 32], strides = [1, 1]} : vector<8x128xf32> to vector<8x32xf32>
    %378 = vector.extract_strided_slice %376 {offsets = [0, 32], sizes = [8, 32], strides = [1, 1]} : vector<8x128xf32> to vector<8x32xf32>
    %379 = vector.extract_strided_slice %376 {offsets = [0, 64], sizes = [8, 32], strides = [1, 1]} : vector<8x128xf32> to vector<8x32xf32>
    %380 = vector.extract_strided_slice %376 {offsets = [0, 96], sizes = [8, 32], strides = [1, 1]} : vector<8x128xf32> to vector<8x32xf32>
    %381 = arith.mulf %378, %362 : vector<8x32xf32>
    %382 = arith.mulf %377, %380 : vector<8x32xf32>
    %383 = arith.addf %381, %382 : vector<8x32xf32>
    %384 = math.tanh %383 : vector<8x32xf32>
    %385 = arith.mulf %379, %384 : vector<8x32xf32>
    %c7_i32_115 = arith.constant 7 : i32
    %386 = arith.index_cast %c7_i32_115 : i32 to index
    %c0_116 = arith.constant 0 : index
    %c0_117 = arith.constant 0 : index
    %387 = vector.load %arg10[%386, %c0_116, %c0_117] : memref<8x8x128xf32, #tpu.memory_space<vmem>>, vector<1x8x128xf32>
    %388 = vector.shape_cast %387 : vector<1x8x128xf32> to vector<8x128xf32>
    %cst_118 = arith.constant dense<0.000000e+00> : vector<8x128xf32>
    %389 = tpu.matmul %385, %229, %cst_118 {dimension_numbers = #tpu.dot_dimension_numbers<[1], [0], [0], [1], [0, 0, 1, 1], [], []>} : vector<8x32xf32>, vector<32x128xf32>, vector<8x128xf32> -> vector<8x128xf32>
    %390 = arith.addf %388, %389 : vector<8x128xf32>
    %391 = arith.negf %390 : vector<8x128xf32>
    %392 = math.exp %391 : vector<8x128xf32>
    %cst_119 = arith.constant 1.000000e+00 : f32
    %393 = vector.broadcast %cst_119 : f32 to vector<8x128xf32>
    %394 = arith.addf %393, %392 : vector<8x128xf32>
    %395 = arith.divf %393, %394 : vector<8x128xf32>
    %396 = math.tanh %390 : vector<8x128xf32>
    %397 = arith.select %2, %395, %396 : vector<8x128xi1>, vector<8x128xf32>
    %398 = vector.extract_strided_slice %397 {offsets = [0, 0], sizes = [8, 32], strides = [1, 1]} : vector<8x128xf32> to vector<8x32xf32>
    %399 = vector.extract_strided_slice %397 {offsets = [0, 32], sizes = [8, 32], strides = [1, 1]} : vector<8x128xf32> to vector<8x32xf32>
    %400 = vector.extract_strided_slice %397 {offsets = [0, 64], sizes = [8, 32], strides = [1, 1]} : vector<8x128xf32> to vector<8x32xf32>
    %401 = vector.extract_strided_slice %397 {offsets = [0, 96], sizes = [8, 32], strides = [1, 1]} : vector<8x128xf32> to vector<8x32xf32>
    %402 = arith.mulf %399, %383 : vector<8x32xf32>
    %403 = arith.mulf %398, %401 : vector<8x32xf32>
    %404 = arith.addf %402, %403 : vector<8x32xf32>
    %405 = math.tanh %404 : vector<8x32xf32>
    %406 = arith.mulf %400, %405 : vector<8x32xf32>
    %c8_i32_120 = arith.constant 8 : i32
    %c1 = arith.constant 1 : index
    %c0_121 = arith.constant 0 : index
    %c0_122 = arith.constant 0 : index
    %407 = vector.load %arg8[%c1, %c0_121, %c0_122] : memref<2x8x32xf32, #tpu.memory_space<vmem>>, vector<1x8x32xf32>
    %408 = vector.shape_cast %407 : vector<1x8x32xf32> to vector<8x32xf32>
    %409 = vector.shape_cast %406 : vector<8x32xf32> to vector<1x8x32xf32>
    tpu.vector_store %arg8[%c1, %c0_121, %c0_122], %409 {strides = array<i32>} : memref<2x8x32xf32, #tpu.memory_space<vmem>>, vector<1x8x32xf32>,
    %c1_123 = arith.constant 1 : index
    %c0_124 = arith.constant 0 : index
    %c0_125 = arith.constant 0 : index
    %410 = vector.load %arg9[%c1_123, %c0_124, %c0_125] : memref<2x8x32xf32, #tpu.memory_space<vmem>>, vector<1x8x32xf32>
    %411 = vector.shape_cast %410 : vector<1x8x32xf32> to vector<8x32xf32>
    %412 = vector.shape_cast %404 : vector<8x32xf32> to vector<1x8x32xf32>
    tpu.vector_store %arg9[%c1_123, %c0_124, %c0_125], %412 {strides = array<i32>} : memref<2x8x32xf32, #tpu.memory_space<vmem>>, vector<1x8x32xf32>,
    return
  }
  func.func @transform_0(%arg0: i32) -> (i32, i32, i32) {
    %c0_i32 = arith.constant 0 : i32
    %c0_i32_0 = arith.constant 0 : i32
    %c0_i32_1 = arith.constant 0 : i32
    return %c0_i32, %arg0, %c0_i32_0 : i32, i32, i32
  }
  func.func @transform_1(%arg0: i32) -> (i32, i32) {
    %c0_i32 = arith.constant 0 : i32
    %c0_i32_0 = arith.constant 0 : i32
    %c0_i32_1 = arith.constant 0 : i32
    return %c0_i32, %c0_i32_0 : i32, i32
  }
  func.func @transform_2(%arg0: i32) -> (i32, i32) {
    %c0_i32 = arith.constant 0 : i32
    %c0_i32_0 = arith.constant 0 : i32
    %c0_i32_1 = arith.constant 0 : i32
    return %c0_i32, %c0_i32_0 : i32, i32
  }
  func.func @transform_3(%arg0: i32) -> (i32, i32) {
    %c0_i32 = arith.constant 0 : i32
    %c0_i32_0 = arith.constant 0 : i32
    %c0_i32_1 = arith.constant 0 : i32
    return %c0_i32, %c0_i32_0 : i32, i32
  }
  func.func @transform_4(%arg0: i32) -> (i32, i32) {
    %c0_i32 = arith.constant 0 : i32
    %c0_i32_0 = arith.constant 0 : i32
    %c0_i32_1 = arith.constant 0 : i32
    return %c0_i32, %c0_i32_0 : i32, i32
  }
  func.func @transform_5(%arg0: i32) -> (i32, i32) {
    %c0_i32 = arith.constant 0 : i32
    %c0_i32_0 = arith.constant 0 : i32
    %c0_i32_1 = arith.constant 0 : i32
    return %c0_i32, %c0_i32_0 : i32, i32
  }
  func.func @transform_6(%arg0: i32) -> (i32, i32) {
    %c0_i32 = arith.constant 0 : i32
    %c0_i32_0 = arith.constant 0 : i32
    %c0_i32_1 = arith.constant 0 : i32
    return %c0_i32, %c0_i32_0 : i32, i32
  }
  func.func @transform_7(%arg0: i32) -> (i32, i32, i32) {
    %c0_i32 = arith.constant 0 : i32
    %c0_i32_0 = arith.constant 0 : i32
    %c0_i32_1 = arith.constant 0 : i32
    return %c0_i32, %arg0, %c0_i32_0 : i32, i32, i32
  }
  func.func @transform_8(%arg0: i32) -> (i32, i32, i32) {
    %c0_i32 = arith.constant 0 : i32
    %c0_i32_0 = arith.constant 0 : i32
    %c0_i32_1 = arith.constant 0 : i32
    return %c0_i32, %arg0, %c0_i32_0 : i32, i32, i32
  }
}

</mosaic_0001>

<bundles_post_ra>
// kernel: tpu_custom_call.1
= control target key start
LH: loop header
LB: loop body
LE: loop exit
PB: predicated region body
PF: predicated region fallthrough
CT: control target
= control target key end

     0   :  { %14 = vsyncpa [#allocation5], 0  ;;  %s3337_s0 = inlined_call_operand.hbm [shape: bf16[8,8,32], index: 0, kind: input, shape index: {}]   ;;  %s3338_s1 = inlined_call_operand.hbm [shape: bf16[32,128], index: 1, kind: input, shape index: {}]   ;;  %s3339_s2 = inlined_call_operand.hbm [shape: f32[32,128], index: 2, kind: input, shape index: {}]   ;;  %s3340_s3 = inlined_call_operand.vmem [shape: f32[1,128], index: 3, kind: input, shape index: {}]   ;;  %s3341_s4 = inlined_call_operand.hbm [shape: bf16[32,128], index: 4, kind: input, shape index: {}]   ;;  %s3342_s5 = inlined_call_operand.hbm [shape: f32[32,128], index: 5, kind: input, shape index: {}]   ;;  %s3343_s6 = inlined_call_operand.vmem [shape: f32[1,128], index: 6, kind: input, shape index: {}]   ;;  %s3344_s7 = inlined_call_operand.hbm [shape: f32[2,8,32], index: 7, kind: output, shape index: {0}]   ;;  %s3345_s8 = inlined_call_operand.hbm [shape: f32[2,8,32], index: 8, kind: output, shape index: {1}]  }
   0x1   :  { %15 = vsyncpa [#allocation8], 0 }
   0x2   :  { %16 = vsyncpa [#allocation11], 0 }
   0x3   :  { %17 = vsyncpa [#allocation6], 0 }
   0x4   :  { %18 = vsyncpa [#allocation15], 0  ;;  %s2809_s27 = smov [#allocation7]   ;;  %s2810_s29 = smov [#allocation10]  }
   0x5   :  { %s36_s28 = sshll.u32 %s2809_s27, 4  ;;  %s62_s30 = sshll.u32 %s2810_s29, 4  ;;  %s37_s28 = int_to_ptr.vmem [resolvable:$true] %s36_s28  ;;  %s63_s30 = int_to_ptr.vmem [resolvable:$true] %s62_s30 }
   0x6   :  { %s2667_s9 = scalar_lea.vmem %s37_s28, 256  ;;  %p2672_p1 = scmp.lt.s32.totalorder %s37_s28, %s37_s28 }
   0x7   :  { %p2668_p0 = scmp.ne.s32.totalorder %s37_s28, %s2667_s9  ;;  %p2673_p2 = scmp.lt.s32.totalorder %s2667_s9, %s2667_s9 }
   0x9   :  { %p2674_p3 = por %p2673_p2, %p2672_p1 }
   0xb   :  { %p2675_p4 = pnand %p2674_p3, %p2668_p0 }
   0xd   :  { %2678 = shalt.err (!%p2675_p4)
}
   0xe   :  { %s2811_s10 = smov 64   ;;  %s2812_s11 = smov 4  }
   0xf   :  { %42 = dma.hbm_to_vmem [thread:$0]  %s3338_s1, 256, %s37_s28, [#allocation8], %s2811_s10, %s2811_s10, %s2812_s11  }
  0x10   :  { %s2687_s14 = scalar_lea.vmem %s63_s30, 256  ;;  %p2692_p6 = scmp.lt.s32.totalorder %s63_s30, %s63_s30 }
  0x11   :  { %p2688_p5 = scmp.ne.s32.totalorder %s63_s30, %s2687_s14  ;;  %p2693_p7 = scmp.lt.s32.totalorder %s2687_s14, %s2687_s14 }
  0x13   :  { %p2694_p8 = por %p2693_p7, %p2692_p6 }
  0x15   :  { %p2695_p9 = pnand %p2694_p8, %p2688_p5 }
  0x17   :  { %2698 = shalt.err (!%p2695_p9)
}
  0x18   :  { %68 = dma.hbm_to_vmem [thread:$0]  %s3341_s4, 256, %s63_s30, [#allocation11], %s2811_s10, %s2811_s10, %s2812_s11  }
  0x19   :  { %s2813_s17 = smov [#allocation4]   ;;  %s2814_s19 = smov [#allocation9]  }
  0x1a   :  { %s24_s18 = sshll.u32 %s2813_s17, 4  ;;  %s48_s20 = sshll.u32 %s2814_s19, 4  ;;  %s25_s18 = int_to_ptr.vmem [resolvable:$true] %s24_s18  ;;  %s49_s20 = int_to_ptr.vmem [resolvable:$true] %s48_s20 }
  0x1b   :  { %s2707_s1 = scalar_lea.vmem %s25_s18, 512  ;;  %p2712_p11 = scmp.lt.s32.totalorder %s25_s18, %s25_s18 }
  0x1c   :  { %p2708_p10 = scmp.ne.s32.totalorder %s25_s18, %s2707_s1  ;;  %p2713_p12 = scmp.lt.s32.totalorder %s2707_s1, %s2707_s1 }
  0x1e   :  { %p2714_p13 = por %p2713_p12, %p2712_p11 }
  0x20   :  { %p2715_p0 = pnand %p2714_p13, %p2708_p10 }
  0x22   :  { %2718 = shalt.err (!%p2715_p0)
}
  0x23   :  { %30 = dma.hbm_to_vmem [thread:$0]  %s3337_s0, 512, %s25_s18, [#allocation5], %s2811_s10, %s2811_s10, %s2812_s11  }
  0x24   :  { %s2727_s4 = scalar_lea.vmem %s49_s20, 512  ;;  %p2732_p2 = scmp.lt.s32.totalorder %s49_s20, %s49_s20 }
  0x25   :  { %p2728_p1 = scmp.ne.s32.totalorder %s49_s20, %s2727_s4  ;;  %p2733_p3 = scmp.lt.s32.totalorder %s2727_s4, %s2727_s4 }
  0x27   :  { %p2734_p4 = por %p2733_p3, %p2732_p2 }
  0x29   :  { %p2735_p5 = pnand %p2734_p4, %p2728_p1 }
  0x2b   :  { %2738 = shalt.err (!%p2735_p5)
}
  0x2c   :  { %s2815_s23 = smov 128   ;;  %s2816_s24 = smov 8  }
  0x2d   :  { %54 = dma.hbm_to_vmem [thread:$0]  %s3339_s2, 512, %s49_s20, [#allocation8], %s2815_s23, %s2815_s23, %s2816_s24  }
  0x2e   :  { %s2817_s27 = smov [#allocation12]  }
  0x2f   :  { %s74_s28 = sshll.u32 %s2817_s27, 4  ;;  %s75_s28 = int_to_ptr.vmem [resolvable:$true] %s74_s28 }
  0x30   :  { %s2747_s0 = scalar_lea.vmem %s75_s28, 512  ;;  %p2752_p7 = scmp.lt.s32.totalorder %s75_s28, %s75_s28 }
  0x31   :  { %p2748_p6 = scmp.ne.s32.totalorder %s75_s28, %s2747_s0  ;;  %p2753_p8 = scmp.lt.s32.totalorder %s2747_s0, %s2747_s0 }
  0x33   :  { %p2754_p9 = por %p2753_p8, %p2752_p7 }
  0x35   :  { %p2755_p10 = pnand %p2754_p9, %p2748_p6 }
  0x37   :  { %2758 = shalt.err (!%p2755_p10)
}
  0x38   :  { %80 = dma.hbm_to_vmem [thread:$0]  %s3342_s5, 512, %s75_s28, [#allocation11], %s2815_s23, %s2815_s23, %s2816_s24  }
  0x39   :  { %2799 = dma.done.wait [#allocation5], 512  }
  0x3a   :  { %2800 = vsyncadd [#allocation5], 4294966784 }
  0x3b   :  { %2801 = dma.done.wait [#allocation8], 768  }
  0x3c   :  { %2802 = vsyncadd [#allocation8], 4294966528 }
  0x3d   :  { %2803 = dma.done.wait [#allocation11], 768  }
  0x3e   :  { %2804 = vsyncadd [#allocation11], 4294966528  ;;  %v2818_v0 = vmov 0.0   ;;  %vm2819_vm0 = vmmov 0   ;;  %v2519_v1 = vld [vmem:[#allocation7 + $0x8] sm:$0xff]   ;;  %v2520_v3 = vld [vmem:[#allocation7] sm:$0xff]   ;;  %v99_v19 = vlaneseq }
  0x3f   :  { %2316 = vmatprep.subr.mxu1 %v2818_v0  ;;  %2324 = vmatprep.mubr.msk.f32.mxu1 %vm2819_vm0, %v2818_v0  ;;  %v2899_v2 = vld [vmem:[#allocation9 + $0x18] sm:$0xff]  ;;  %v2902_v4 = vld [vmem:[#allocation9 + $0x10] sm:$0xff]  ;;  %vm157_vm1 = vcmask 261120   ;;  %v2905_v6 = vld [vmem:[#allocation9 + $0x8] sm:$0xff]  ;;  %vm350_vm3 = vcmask 257024   ;;  %s2822_s12 = smov [#allocation14]  }
  0x40   :  { %2304 = vmatprep.subr.bf16.mxu0 %v2519_v1  ;;  %2317 = vmatpush3.msra.mxu1 %v2899_v2  ;;  %v2521_v5 = vld [vmem:[#allocation4] sm:$0xff]   ;;  %v2522_v7 = vld [vmem:[#allocation4 + $0x8] sm:$0xff]   ;;  %v2910_v8 = vld [vmem:[#allocation9] sm:$0xff]  ;;  %v2945_v20 = vand.u32 127, %v99_v19  ;;  %s2126_s13 = sshll.u32 %s2822_s12, 4  ;;  %s2127_s13 = int_to_ptr.vmem [resolvable:$true] %s2126_s13 }
  0x41   :  { %2305 = vmatpush3.bf16.msra.mxu0 %v2519_v1  ;;  %2318 = vmatprep.subr.mxu1 %v2818_v0  ;;  %v2942_v12 = vld [vmem:[%s3340_s3] ss:$0 sm:$0xff]  ;;  %s2820_s3 = smov 32   ;;  %v2523_v50 = vld [vmem:[#allocation4 + $0x10] sm:$0xff]   ;;  %v2524_v51 = vld [vmem:[#allocation4 + $0x18] sm:$0xff]   ;;  %s2759_s14 = scalar_lea.vmem %s2127_s13, 256 }
  0x42   :  { %2306 = vmatprep.subr.bf16.mxu0 %v2520_v3  ;;  %2319 = vmatpush3.msra.mxu1 %v2902_v4  ;;  %vm101_vm2 = vcmp.lt.s32.totalorder %v2945_v20, 96  ;;  %p2760_p11 = scmp.ne.s32.totalorder %s2127_s13, %s2759_s14  ;;  %p2764_p12 = scmp.lt.s32.totalorder %s2127_s13, %s2127_s13 }
  0x43   :  { %2320 = vmatprep.subr.mxu1 %v2818_v0  ;;  %2308 = vmatprep.mubr.msk.bf16.mxu0 %vm157_vm1, %v2521_v5  ;;  %p2765_p13 = scmp.lt.s32.totalorder %s2759_s14, %s2759_s14 }
  0x44   :  { %2321 = vmatpush3.msra.mxu1 %v2905_v6 }
  0x45   :  { %2307 = vmatpush3.bf16.msra.mxu0 %v2520_v3  ;;  %2322 = vmatprep.subr.mxu1 %v2818_v0  ;;  %p2766_p0 = por %p2765_p13, %p2764_p12 }
  0x46   :  { %2323 = vmatpush3.msra.mxu1 %v2910_v8  ;;  %2338 = vmatprep.subr.mxu0 %v2818_v0 }
  0x47   :  { %2325 = vmatmul.mubr.f32.vlgmr.msra.gmra.mxu1 %v2818_v0  ;;  %2327 = vmatprep.subr.mxu1 %v2818_v0  ;;  %p2767_p1 = pnand %p2766_p0, %p2760_p11 }
  0x48   :  { %2309 = vmatmul.mubr.msk.bf16.vlgmr.msra.gmra.mxu0 %vm157_vm1, %v2522_v7  ;;  %2328 = vmatpush3.msra.mxu1 %v2899_v2 }
  0x49   :  { %2329 = vmatprep.subr.mxu1 %v2818_v0  ;;  %2335 = vmatprep.mubr.msk.f32.mxu1 %vm2819_vm0, %v2818_v0 }
  0x4a   :  { %2330 = vmatpush3.msra.mxu1 %v2902_v4  ;;  %2339 = vmatpush3.msra.mxu0 %v2899_v2 }
  0x4b   :  { %2331 = vmatprep.subr.mxu1 %v2818_v0  ;;  %2340 = vmatprep.subr.mxu0 %v2818_v0 }
  0x4c   :  { %2332 = vmatpush3.msra.mxu1 %v2905_v6  ;;  %2341 = vmatpush3.msra.mxu0 %v2902_v4 }
  0x4d   :  { %2333 = vmatprep.subr.mxu1 %v2818_v0  ;;  %2342 = vmatprep.subr.mxu0 %v2818_v0 }
  0x4e   :  { %2334 = vmatpush3.msra.mxu1 %v2910_v8  ;;  %2343 = vmatpush3.msra.mxu0 %v2905_v6 }
  0x4f   :  { %2344 = vmatprep.subr.mxu0 %v2818_v0  ;;  %2349 = vmatprep.subr.mxu1 %v2818_v0 }
  0x50   :  { %2345 = vmatpush3.msra.mxu0 %v2910_v8  ;;  %2312 = vmatprep.mubr.msk.bf16.mxu0 %vm157_vm1, %v2523_v50 }
  0x51   :  { %2360 = vmatprep.subr.mxu0 %v2818_v0  ;;  %2313 = vmatmul.mubr.msk.bf16.gmra.mxu0 %vm157_vm1, %v2524_v51 }
  0x52   :  { %2346 = vmatprep.mubr.msk.f32.mxu0 %vm2819_vm0, %v2818_v0 }
 0x107   :  { %v313_v9 = vpop.f32.mrf.mxu1 }
 0x108   :  { %v2937_v10 = vpop.f32.mrf.mxu0 }
 0x109   :  { %v2326_v11 = vpop.f32.mrf.mxu1  ;;  %v213_v60 = vadd.f32 %v2937_v10, %v2942_v12 }
 0x10a   :  { %v204_v13 = vpop.f32.mrf.mxu0 }
 0x10b   :  { %v205_v14 = vadd.f32 %v2942_v12, %v204_v13 }
 0x10c   :  { %v2968_v33 = vpop.f32.mrf.mxu0 }
 0x10d   :  { %v317_v15 = vadd.f32 %v313_v9, %v205_v14 }
 0x10e   :  { %v207_v34 = vpop.f32.mrf.mxu0 }
 0x10f   :  { %v2155_v16 = vmul.f32 -1.442695, %v317_v15  ;;  %v208_v35 = vadd.f32 %v2942_v12, %v207_v34 }
 0x111   :  { %2531 = vpow2.f32 %v2155_v16  ;;  %v2995_v56 = vpop.f32.mrf.mxu0 }
 0x112   :  { %2533 = vtanh.f32 %v317_v15 }
 0x113   :  { %v2997_v57 = vpop.f32.mrf.mxu0 }
 0x115   :  { %v2999_v58 = vpop.f32.mrf.mxu0 }
 0x117   :  { %v3001_v59 = vpop.f32.mrf.mxu0 }
 0x11e   :  { %v2532_v17 = vpop.eup %2531 }
 0x11f   :  { %v321_v18 = vadd.f32 1.0, %v2532_v17  ;;  %v2534_v21 = vpop.eup %2533 }
 0x121   :  { %2535 = vrcp.f32 %v321_v18 }
 0x12e   :  { %v2536_v22 = vpop.eup %2535 }
 0x12f   :  { %v325_v23 = vsel %vm101_vm2, %v2536_v22, %v2534_v21  ;;  %v216_v22 = vadd.f32 %v2968_v33, %v2942_v12 }
 0x130   :  { %328 = vrot.lane.b32.xlu0 %v325_v23, %s2820_s3  ;;  %v326_v26 = vmul.f32 0.0, %v325_v23 }
 0x1a2   :  { %v329_v24 = vpop.permute.xlu0 %328 }
 0x1a3   :  { %v331_v25 = vmul.f32 %v329_v24, %v325_v23 }
 0x1a5   :  { %333 = vrot.lane.b32.xlu0 %v331_v25, %s2820_s3 }
 0x217   :  { %v334_v27 = vpop.permute.xlu0 %333 }
 0x218   :  { %v336_v28 = vadd.f32 %v334_v27, %v326_v26 }
 0x21a   :  { %2537 = vtanh.f32 %v336_v28 }
 0x227   :  { %v2538_v29 = vpop.eup %2537 }
 0x228   :  { %339 = vrot.lane.b32.xlu1 %v2538_v29, %s2820_s3 }
 0x29a   :  { %v340_v30 = vpop.permute.xlu1 %339 }
 0x29b   :  { %v2953_v31 = vmul.f32 %v340_v30, %v325_v23 }
 0x29d   :  { %355 = vrot.lane.b32.xlu1 %v2953_v31, %s2811_s10 }
 0x30f   :  { %v356_v32 = vpop.permute.xlu1 %355 }
 0x310   :  { %2336 = vmatmul.mubr.msk.f32.vlgmr.msra.gmra.mxu1 %vm157_vm1, %v356_v32 }
 0x311   :  { %2350 = vmatpush3.msra.mxu1 %v2899_v2  ;;  %2357 = vmatprep.mubr.msk.f32.mxu1 %vm2819_vm0, %v2818_v0 }
 0x312   :  { %2351 = vmatprep.subr.mxu1 %v2818_v0 }
 0x313   :  { %2352 = vmatpush3.msra.mxu1 %v2902_v4 }
 0x314   :  { %2353 = vmatprep.subr.mxu1 %v2818_v0 }
 0x315   :  { %2354 = vmatpush3.msra.mxu1 %v2905_v6 }
 0x316   :  { %2355 = vmatprep.subr.mxu1 %v2818_v0 }
 0x317   :  { %2356 = vmatpush3.msra.mxu1 %v2910_v8 }
 0x318   :  { %2371 = vmatprep.subr.mxu1 %v2818_v0 }
 0x3d0   :  { %v425_v36 = vpop.f32.mrf.mxu1 }
 0x3d1   :  { %v429_v37 = vadd.f32 %v425_v36, %v208_v35 }
 0x3d2   :  { %v2337_v38 = vpop.f32.mrf.mxu1 }
 0x3d3   :  { %v2158_v39 = vmul.f32 -1.442695, %v429_v37 }
 0x3d5   :  { %2539 = vpow2.f32 %v2158_v39 }
 0x3d6   :  { %2541 = vtanh.f32 %v429_v37 }
 0x3e2   :  { %v2540_v40 = vpop.eup %2539 }
 0x3e3   :  { %v433_v41 = vadd.f32 1.0, %v2540_v40  ;;  %v2542_v42 = vpop.eup %2541 }
 0x3e5   :  { %2543 = vrcp.f32 %v433_v41 }
 0x3f2   :  { %v2544_v43 = vpop.eup %2543 }
 0x3f3   :  { %v437_v44 = vsel %vm101_vm2, %v2544_v43, %v2542_v42  ;;  %v221_v42 = vadd.f32 %v2942_v12, %v2997_v57 }
 0x3f4   :  { %440 = vrot.lane.b32.xlu0 %v437_v44, %s2820_s3  ;;  %v438_v47 = vmul.f32 %v437_v44, %v336_v28 }
 0x466   :  { %v441_v45 = vpop.permute.xlu0 %440 }
 0x467   :  { %v443_v46 = vmul.f32 %v441_v45, %v437_v44 }
 0x469   :  { %445 = vrot.lane.b32.xlu1 %v443_v46, %s2820_s3 }
 0x4db   :  { %v446_v48 = vpop.permute.xlu1 %445 }
 0x4dc   :  { %v448_v49 = vadd.f32 %v446_v48, %v438_v47 }
 0x4de   :  { %2545 = vtanh.f32 %v448_v49 }
 0x4eb   :  { %v2546_v52 = vpop.eup %2545 }
 0x4ec   :  { %451 = vrot.lane.b32.xlu0 %v2546_v52, %s2820_s3 }
 0x55e   :  { %v452_v53 = vpop.permute.xlu0 %451 }
 0x55f   :  { %v2980_v54 = vmul.f32 %v452_v53, %v437_v44 }
 0x561   :  { %467 = vrot.lane.b32.xlu1 %v2980_v54, %s2811_s10 }
 0x5d3   :  { %v468_v55 = vpop.permute.xlu1 %467 }
 0x5d4   :  { %2347 = vmatmul.mubr.msk.f32.vlgmr.msra.gmra.mxu0 %vm157_vm1, %v468_v55 }
 0x5d5   :  { %2361 = vmatpush3.msra.mxu0 %v2899_v2  ;;  %2368 = vmatprep.mubr.msk.f32.mxu0 %vm2819_vm0, %v2818_v0 }
 0x5d6   :  { %2362 = vmatprep.subr.mxu0 %v2818_v0 }
 0x5d7   :  { %2363 = vmatpush3.msra.mxu0 %v2902_v4 }
 0x5d8   :  { %2364 = vmatprep.subr.mxu0 %v2818_v0 }
 0x5d9   :  { %2365 = vmatpush3.msra.mxu0 %v2905_v6 }
 0x5da   :  { %2366 = vmatprep.subr.mxu0 %v2818_v0 }
 0x5db   :  { %2367 = vmatpush3.msra.mxu0 %v2910_v8 }
 0x5dc   :  { %2382 = vmatprep.subr.mxu0 %v2818_v0 }
 0x694   :  { %v537_v61 = vpop.f32.mrf.mxu0 }
 0x695   :  { %v541_v62 = vadd.f32 %v537_v61, %v213_v60 }
 0x696   :  { %v2348_v63 = vpop.f32.mrf.mxu0 }
 0x697   :  { %v2161_v1 = vmul.f32 -1.442695, %v541_v62 }
 0x699   :  { %2547 = vpow2.f32 %v2161_v1 }
 0x69a   :  { %2549 = vtanh.f32 %v541_v62 }
 0x6a6   :  { %v2548_v3 = vpop.eup %2547 }
 0x6a7   :  { %v545_v5 = vadd.f32 1.0, %v2548_v3  ;;  %v2550_v7 = vpop.eup %2549 }
 0x6a9   :  { %2551 = vrcp.f32 %v545_v5 }
 0x6b6   :  { %v2552_v9 = vpop.eup %2551 }
 0x6b7   :  { %v549_v11 = vsel %vm101_vm2, %v2552_v9, %v2550_v7 }
 0x6b8   :  { %552 = vrot.lane.b32.xlu0 %v549_v11, %s2820_s3  ;;  %v550_v10 = vmul.f32 %v549_v11, %v448_v49 }
 0x72a   :  { %v553_v13 = vpop.permute.xlu0 %552 }
 0x72b   :  { %v555_v14 = vmul.f32 %v553_v13, %v549_v11 }
 0x72d   :  { %557 = vrot.lane.b32.xlu1 %v555_v14, %s2820_s3 }
 0x79f   :  { %v558_v15 = vpop.permute.xlu1 %557 }
 0x7a0   :  { %v560_v16 = vadd.f32 %v558_v15, %v550_v10 }
 0x7a2   :  { %2553 = vtanh.f32 %v560_v16 }
 0x7af   :  { %v2554_v17 = vpop.eup %2553 }
 0x7b0   :  { %563 = vrot.lane.b32.xlu0 %v2554_v17, %s2820_s3 }
 0x822   :  { %v564_v18 = vpop.permute.xlu0 %563 }
 0x823   :  { %v3010_v19 = vmul.f32 %v564_v18, %v549_v11 }
 0x825   :  { %579 = vrot.lane.b32.xlu1 %v3010_v19, %s2811_s10 }
 0x897   :  { %v580_v21 = vpop.permute.xlu1 %579 }
 0x898   :  { %2358 = vmatmul.mubr.msk.f32.vlgmr.msra.gmra.mxu1 %vm157_vm1, %v580_v21 }
 0x899   :  { %2372 = vmatpush3.msra.mxu1 %v2899_v2  ;;  %2379 = vmatprep.mubr.msk.f32.mxu1 %vm2819_vm0, %v2818_v0 }
 0x89a   :  { %2373 = vmatprep.subr.mxu1 %v2818_v0 }
 0x89b   :  { %2374 = vmatpush3.msra.mxu1 %v2902_v4 }
 0x89c   :  { %2375 = vmatprep.subr.mxu1 %v2818_v0 }
 0x89d   :  { %2376 = vmatpush3.msra.mxu1 %v2905_v6 }
 0x89e   :  { %2377 = vmatprep.subr.mxu1 %v2818_v0 }
 0x89f   :  { %2378 = vmatpush3.msra.mxu1 %v2910_v8 }
 0x8a0   :  { %2393 = vmatprep.subr.mxu1 %v2818_v0 }
 0x958   :  { %v649_v23 = vpop.f32.mrf.mxu1 }
 0x959   :  { %v653_v24 = vadd.f32 %v649_v23, %v216_v22  ;;  %v229_v23 = vadd.f32 %v2995_v56, %v2942_v12  ;;  %v2204_v56 = vpack.c.bf16 %v2953_v31, %v2953_v31  ;;  %v2525_v31 = vld [vmem:[#allocation10 + $0x8] sm:$0xff]  }
 0x95a   :  { %v2359_v25 = vpop.f32.mrf.mxu1 }
 0x95b   :  { %v2164_v26 = vmul.f32 -1.442695, %v653_v24 }
 0x95d   :  { %2555 = vpow2.f32 %v2164_v26 }
 0x95e   :  { %2557 = vtanh.f32 %v653_v24 }
 0x96a   :  { %v2556_v27 = vpop.eup %2555 }
 0x96b   :  { %v657_v28 = vadd.f32 1.0, %v2556_v27  ;;  %v2558_v29 = vpop.eup %2557 }
 0x96d   :  { %2559 = vrcp.f32 %v657_v28 }
 0x97a   :  { %v2560_v30 = vpop.eup %2559 }
 0x97b   :  { %v661_v32 = vsel %vm101_vm2, %v2560_v30, %v2558_v29 }
 0x97c   :  { %664 = vrot.lane.b32.xlu0 %v661_v32, %s2820_s3  ;;  %v662_v33 = vmul.f32 %v661_v32, %v560_v16 }
 0x9ee   :  { %v665_v34 = vpop.permute.xlu0 %664 }
 0x9ef   :  { %v667_v35 = vmul.f32 %v665_v34, %v661_v32 }
 0x9f1   :  { %669 = vrot.lane.b32.xlu1 %v667_v35, %s2820_s3 }
 0xa63   :  { %v670_v36 = vpop.permute.xlu1 %669 }
 0xa64   :  { %v672_v37 = vadd.f32 %v670_v36, %v662_v33  ;;  %v2206_v36 = vpack.c.bf16 %v3010_v19, %v3010_v19 }
 0xa66   :  { %2561 = vtanh.f32 %v672_v37 }
 0xa73   :  { %v2562_v38 = vpop.eup %2561 }
 0xa74   :  { %675 = vrot.lane.b32.xlu0 %v2562_v38, %s2820_s3 }
 0xae6   :  { %v676_v39 = vpop.permute.xlu0 %675 }
 0xae7   :  { %v3032_v40 = vmul.f32 %v676_v39, %v661_v32 }
 0xae9   :  { %691 = vrot.lane.b32.xlu1 %v3032_v40, %s2811_s10 }
 0xb5b   :  { %v692_v41 = vpop.permute.xlu1 %691 }
 0xb5c   :  { %2369 = vmatmul.mubr.msk.f32.vlgmr.msra.gmra.mxu0 %vm157_vm1, %v692_v41 }
 0xb5d   :  { %2383 = vmatpush3.msra.mxu0 %v2899_v2  ;;  %2390 = vmatprep.mubr.msk.f32.mxu0 %vm2819_vm0, %v2818_v0 }
 0xb5e   :  { %2384 = vmatprep.subr.mxu0 %v2818_v0 }
 0xb5f   :  { %2385 = vmatpush3.msra.mxu0 %v2902_v4 }
 0xb60   :  { %2386 = vmatprep.subr.mxu0 %v2818_v0 }
 0xb61   :  { %2387 = vmatpush3.msra.mxu0 %v2905_v6 }
 0xb62   :  { %2388 = vmatprep.subr.mxu0 %v2818_v0 }
 0xb63   :  { %2389 = vmatpush3.msra.mxu0 %v2910_v8 }
 0xb64   :  { %2404 = vmatprep.subr.bf16.mxu0 %v2525_v31 }
 0xc1c   :  { %v761_v43 = vpop.f32.mrf.mxu0 }
 0xc1d   :  { %v765_v44 = vadd.f32 %v761_v43, %v221_v42  ;;  %v2526_v43 = vld [vmem:[#allocation10] sm:$0xff]  }
 0xc1e   :  { %v2370_v45 = vpop.f32.mrf.mxu0 }
 0xc1f   :  { %v2167_v46 = vmul.f32 -1.442695, %v765_v44  ;;  %v2207_v45 = vpack.c.bf16 %v3032_v40, %v3032_v40  ;;  %v3113_v40 = vld [vmem:[#allocation12 + $0x18] sm:$0xff] }
 0xc21   :  { %2563 = vpow2.f32 %v2167_v46 }
 0xc22   :  { %2565 = vtanh.f32 %v765_v44  ;;  %v2205_v44 = vpack.c.bf16 %v2980_v54, %v2980_v54 }
 0xc2e   :  { %v2564_v47 = vpop.eup %2563 }
 0xc2f   :  { %v769_v48 = vadd.f32 1.0, %v2564_v47  ;;  %v2566_v49 = vpop.eup %2565 }
 0xc31   :  { %2567 = vrcp.f32 %v769_v48 }
 0xc3e   :  { %v2568_v50 = vpop.eup %2567 }
 0xc3f   :  { %v773_v51 = vsel %vm101_vm2, %v2568_v50, %v2566_v49 }
 0xc40   :  { %776 = vrot.lane.b32.xlu0 %v773_v51, %s2820_s3  ;;  %v774_v55 = vmul.f32 %v773_v51, %v672_v37 }
 0xcb2   :  { %v777_v52 = vpop.permute.xlu0 %776 }
 0xcb3   :  { %v779_v53 = vmul.f32 %v777_v52, %v773_v51  ;;  %v3120_v52 = vld [vmem:[#allocation12 + $0x8] sm:$0xff] }
 0xcb5   :  { %781 = vrot.lane.b32.xlu1 %v779_v53, %s2820_s3  ;;  %v3124_v53 = vld [vmem:[#allocation12] sm:$0xff] }
 0xd27   :  { %v782_v57 = vpop.permute.xlu1 %781 }
 0xd28   :  { %v784_v60 = vadd.f32 %v782_v57, %v774_v55  ;;  %v232_v57 = vadd.f32 %v2999_v58, %v2942_v12 }
 0xd2a   :  { %2569 = vtanh.f32 %v784_v60 }
 0xd37   :  { %v2570_v61 = vpop.eup %2569 }
 0xd38   :  { %787 = vrot.lane.b32.xlu0 %v2570_v61, %s2820_s3 }
 0xdaa   :  { %v788_v62 = vpop.permute.xlu0 %787 }
 0xdab   :  { %v3053_v63 = vmul.f32 %v788_v62, %v773_v51  ;;  %v3116_v51 = vld [vmem:[#allocation12 + $0x10] sm:$0xff] }
 0xdad   :  { %803 = vrot.lane.b32.xlu1 %v3053_v63, %s2811_s10 }
 0xe1f   :  { %v804_v1 = vpop.permute.xlu1 %803 }
 0xe20   :  { %2380 = vmatmul.mubr.msk.f32.vlgmr.msra.gmra.mxu1 %vm157_vm1, %v804_v1 }
 0xe21   :  { %2394 = vmatpush3.msra.mxu1 %v2899_v2  ;;  %2401 = vmatprep.mubr.msk.f32.mxu1 %vm2819_vm0, %v2818_v0  ;;  %v224_v2 = vadd.f32 %v2942_v12, %v3001_v59 }
 0xe22   :  { %2395 = vmatprep.subr.mxu1 %v2818_v0 }
 0xe23   :  { %2396 = vmatpush3.msra.mxu1 %v2902_v4 }
 0xe24   :  { %2397 = vmatprep.subr.mxu1 %v2818_v0 }
 0xe25   :  { %2398 = vmatpush3.msra.mxu1 %v2905_v6 }
 0xe26   :  { %2399 = vmatprep.subr.mxu1 %v2818_v0 }
 0xe27   :  { %2400 = vmatpush3.msra.mxu1 %v2910_v8 }
 0xe28   :  { %2416 = vmatprep.subr.mxu1 %v2818_v0 }
 0xee0   :  { %v873_v3 = vpop.f32.mrf.mxu1 }
 0xee1   :  { %v877_v5 = vadd.f32 %v873_v3, %v224_v2  ;;  %v3158_v3 = vld [vmem:[%s3343_s6] ss:$0 sm:$0xff]  ;;  %s2821_s6 = smov 96  }
 0xee2   :  { %v2381_v7 = vpop.f32.mrf.mxu1 }
 0xee3   :  { %v2170_v9 = vmul.f32 -1.442695, %v877_v5 }
 0xee5   :  { %2571 = vpow2.f32 %v2170_v9 }
 0xee6   :  { %2573 = vtanh.f32 %v877_v5 }
 0xef2   :  { %v2572_v11 = vpop.eup %2571 }
 0xef3   :  { %v881_v4 = vadd.f32 1.0, %v2572_v11  ;;  %v2574_v13 = vpop.eup %2573 }
 0xef5   :  { %2575 = vrcp.f32 %v881_v4 }
 0xf02   :  { %v2576_v6 = vpop.eup %2575 }
 0xf03   :  { %v885_v14 = vsel %vm101_vm2, %v2576_v6, %v2574_v13 }
 0xf04   :  { %888 = vrot.lane.b32.xlu0 %v885_v14, %s2820_s3  ;;  %v886_v59 = vmul.f32 %v885_v14, %v784_v60 }
 0xf76   :  { %v889_v8 = vpop.permute.xlu0 %888 }
 0xf77   :  { %v891_v10 = vmul.f32 %v889_v8, %v885_v14 }
 0xf79   :  { %893 = vrot.lane.b32.xlu1 %v891_v10, %s2820_s3 }
 0xfeb   :  { %v894_v15 = vpop.permute.xlu1 %893 }
 0xfec   :  { %v896_v16 = vadd.f32 %v894_v15, %v886_v59 }
 0xfee   :  { %2577 = vtanh.f32 %v896_v16 }
 0xffb   :  { %v2578_v17 = vpop.eup %2577 }
 0xffc   :  { %899 = vrot.lane.b32.xlu0 %v2578_v17, %s2820_s3 }
0x106e   :  { %v900_v18 = vpop.permute.xlu0 %899 }
0x106f   :  { %v3075_v21 = vmul.f32 %v900_v18, %v885_v14 }
0x1071   :  { %915 = vrot.lane.b32.xlu1 %v3075_v21, %s2811_s10 }
0x10e3   :  { %v916_v22 = vpop.permute.xlu1 %915 }
0x10e4   :  { %2391 = vmatmul.mubr.msk.f32.vlgmr.msra.gmra.mxu0 %vm157_vm1, %v916_v22 }
0x10e5   :  { %2405 = vmatpush3.bf16.msra.mxu0 %v2525_v31 }
0x10e6   :  { %2406 = vmatprep.subr.bf16.mxu0 %v2526_v43 }
0x10e9   :  { %2407 = vmatpush3.bf16.msra.mxu0 %v2526_v43 }
0x10ea   :  { %2438 = vmatprep.subr.mxu0 %v2818_v0 }
0x11a4   :  { %v985_v24 = vpop.f32.mrf.mxu0 }
0x11a5   :  { %v989_v25 = vadd.f32 %v985_v24, %v229_v23 }
0x11a6   :  { %v2392_v26 = vpop.f32.mrf.mxu0 }
0x11a7   :  { %v2173_v27 = vmul.f32 -1.442695, %v989_v25 }
0x11a9   :  { %2579 = vpow2.f32 %v2173_v27 }
0x11aa   :  { %2581 = vtanh.f32 %v989_v25 }
0x11b6   :  { %v2580_v28 = vpop.eup %2579 }
0x11b7   :  { %v993_v29 = vadd.f32 1.0, %v2580_v28  ;;  %v2582_v30 = vpop.eup %2581 }
0x11b9   :  { %2583 = vrcp.f32 %v993_v29 }
0x11c6   :  { %v2584_v32 = vpop.eup %2583 }
0x11c7   :  { %v997_v34 = vsel %vm101_vm2, %v2584_v32, %v2582_v30 }
0x11c8   :  { %1000 = vrot.lane.b32.xlu0 %v997_v34, %s2820_s3  ;;  %v998_v37 = vmul.f32 %v997_v34, %v896_v16 }
0x123a   :  { %v1001_v35 = vpop.permute.xlu0 %1000 }
0x123b   :  { %v1003_v33 = vmul.f32 %v1001_v35, %v997_v34 }
0x123d   :  { %1005 = vrot.lane.b32.xlu1 %v1003_v33, %s2820_s3 }
0x1241   :  { %347 = vrot.lane.b32.xlu1 %v2204_v56, %s2811_s10 }
0x1245   :  { %571 = vrot.lane.b32.xlu1 %v2206_v36, %s2811_s10  ;;  %v2208_v36 = vpack.c.bf16 %v3053_v63, %v3053_v63 }
0x12af   :  { %v1006_v38 = vpop.permute.xlu1 %1005 }
0x12b0   :  { %v3092_v39 = vadd.f32 %v1006_v38, %v998_v37 }
0x12b2   :  { %2585 = vtanh.f32 %v3092_v39 }
0x12b3   :  { %v348_v41 = vpop.permute.xlu1 %347 }
0x12b4   :  { %351 = vst.msk [vmem:[#allocation3] sm:$0xf] %vm350_vm3, %v348_v41 }
0x12b7   :  { %v572_v42 = vpop.permute.xlu1 %571 }
0x12b8   :  { %575 = vst.msk [vmem:[#allocation3 + $0x8] sm:$0xf] %vm350_vm3, %v572_v42 }
0x12bf   :  { %v2586_v19 = vpop.eup %2585 }
0x12c0   :  { %1011 = vrot.lane.b32.xlu0 %v2586_v19, %s2820_s3 }
0x12c4   :  { %459 = vrot.lane.b32.xlu0 %v2205_v44, %s2811_s10 }
0x12c8   :  { %683 = vrot.lane.b32.xlu0 %v2207_v45, %s2811_s10 }
0x1332   :  { %v1012_v46 = vpop.permute.xlu0 %1011 }
0x1333   :  { %v3105_v47 = vmul.f32 %v1012_v46, %v997_v34 }
0x1335   :  { %1027 = vrot.lane.b32.xlu1 %v3105_v47, %s2811_s10  ;;  %v2210_v37 = vpack.c.bf16 %v3105_v47, %v3105_v47 }
0x1336   :  { %v460_v48 = vpop.permute.xlu0 %459 }
0x1337   :  { %463 = vst.msk [vmem:[#allocation3 + $0x4] sm:$0xf] %vm350_vm3, %v460_v48 }
0x133a   :  { %v684_v49 = vpop.permute.xlu0 %683 }
0x133b   :  { %687 = vst.msk [vmem:[#allocation3 + $0xc] sm:$0xf] %vm350_vm3, %v684_v49 }
0x133e   :  { %v2527_v54 = vld [vmem:[#allocation3] sm:$0xff]  }
0x133f   :  { %2408 = vmatprep.mubr.msk.bf16.mxu0 %vm157_vm1, %v2527_v54 }
0x1342   :  { %v2528_v50 = vld [vmem:[#allocation3 + $0x8] sm:$0xff]  }
0x1343   :  { %2409 = vmatmul.mubr.msk.bf16.vlgmr.msra.gmra.mxu0 %vm157_vm1, %v2528_v50 }
0x1344   :  { %2439 = vmatpush3.msra.mxu0 %v3113_v40 }
0x1345   :  { %2440 = vmatprep.subr.mxu0 %v2818_v0 }
0x1346   :  { %2441 = vmatpush3.msra.mxu0 %v3116_v51 }
0x1347   :  { %2442 = vmatprep.subr.mxu0 %v2818_v0 }
0x1348   :  { %2443 = vmatpush3.msra.mxu0 %v3120_v52 }
0x1349   :  { %2444 = vmatprep.subr.mxu0 %v2818_v0 }
0x134a   :  { %2445 = vmatpush3.msra.mxu0 %v3124_v53 }
0x134b   :  { %2460 = vmatprep.subr.mxu0 %v2818_v0 }
0x13a7   :  { %v1028_v55 = vpop.permute.xlu1 %1027 }
0x13a8   :  { %2402 = vmatmul.mubr.msk.f32.vlgmr.msra.gmra.mxu1 %vm157_vm1, %v1028_v55 }
0x13a9   :  { %2417 = vmatpush3.msra.mxu1 %v3113_v40  ;;  %2424 = vmatprep.mubr.msk.f32.mxu1 %vm2819_vm0, %v2818_v0 }
0x13aa   :  { %2418 = vmatprep.subr.mxu1 %v2818_v0 }
0x13ab   :  { %2419 = vmatpush3.msra.mxu1 %v3116_v51 }
0x13ac   :  { %2420 = vmatprep.subr.mxu1 %v2818_v0 }
0x13ad   :  { %2421 = vmatpush3.msra.mxu1 %v3120_v52 }
0x13ae   :  { %2422 = vmatprep.subr.mxu1 %v2818_v0 }
0x13af   :  { %2423 = vmatpush3.msra.mxu1 %v3124_v53 }
0x13b0   :  { %2425 = vmatmul.mubr.f32.vlgmr.msra.gmra.mxu1 %v2818_v0  ;;  %2427 = vmatprep.subr.mxu1 %v2818_v0 }
0x13b1   :  { %2428 = vmatpush3.msra.mxu1 %v3113_v40  ;;  %2435 = vmatprep.mubr.msk.f32.mxu1 %vm2819_vm0, %v2818_v0 }
0x13b2   :  { %2429 = vmatprep.subr.mxu1 %v2818_v0 }
0x13b3   :  { %2430 = vmatpush3.msra.mxu1 %v3116_v51 }
0x13b4   :  { %2431 = vmatprep.subr.mxu1 %v2818_v0 }
0x13b5   :  { %2432 = vmatpush3.msra.mxu1 %v3120_v52 }
0x13b6   :  { %2433 = vmatprep.subr.mxu1 %v2818_v0 }
0x13b7   :  { %2434 = vmatpush3.msra.mxu1 %v3124_v53 }
0x13b8   :  { %2449 = vmatprep.subr.mxu1 %v2818_v0 }
0x1403   :  { %v3153_v60 = vpop.f32.mrf.mxu0 }
0x1405   :  { %v1247_v2 = vpop.f32.mrf.mxu0 }
0x1406   :  { %v1248_v5 = vadd.f32 %v3158_v3, %v1247_v2 }
0x1407   :  { %v3195_v42 = vpop.f32.mrf.mxu0 }
0x1409   :  { %v1250_v31 = vpop.f32.mrf.mxu0 }
0x140a   :  { %v1251_v43 = vadd.f32 %v3158_v3, %v1250_v31 }
0x1468   :  { %v1097_v61 = vpop.f32.mrf.mxu1 }
0x1469   :  { %v1101_v62 = vadd.f32 %v1097_v61, %v232_v57 }
0x146a   :  { %v2403_v1 = vpop.f32.mrf.mxu1 }
0x146b   :  { %v2176_v59 = vmul.f32 -1.442695, %v1101_v62 }
0x1470   :  { %v1353_v7 = vpop.f32.mrf.mxu1 }
0x1471   :  { %v1357_v9 = vadd.f32 %v1353_v7, %v1248_v5  ;;  %v2209_v5 = vpack.c.bf16 %v3075_v21, %v3075_v21 }
0x1472   :  { %v2426_v11 = vpop.f32.mrf.mxu1 }
0x1473   :  { %v2189_v4 = vmul.f32 -1.442695, %v1357_v9 }
0x1475   :  { %2587 = vpow2.f32 %v2189_v4 }
0x1476   :  { %2589 = vtanh.f32 %v1357_v9 }
0x1482   :  { %v2588_v13 = vpop.eup %2587 }
0x1483   :  { %v1361_v12 = vadd.f32 1.0, %v2588_v13  ;;  %v2590_v58 = vpop.eup %2589 }
0x1485   :  { %2591 = vrcp.f32 %v1361_v12 }
0x1486   :  { %2593 = vpow2.f32 %v2176_v59  ;;  %v1256_v59 = vadd.f32 %v3153_v60, %v3158_v3 }
0x1492   :  { %v2592_v6 = vpop.eup %2591 }
0x1493   :  { %v1365_v14 = vsel %vm101_vm2, %v2592_v6, %v2590_v58  ;;  %v2594_v15 = vpop.eup %2593 }
0x1494   :  { %1368 = vrot.lane.b32.xlu0 %v1365_v14, %s2820_s3  ;;  %v1366_v16 = vmul.f32 0.0, %v1365_v14  ;;  %v1105_v17 = vadd.f32 1.0, %v2594_v15 }
0x1506   :  { %v1369_v8 = vpop.permute.xlu0 %1368 }
0x1507   :  { %v1371_v10 = vmul.f32 %v1369_v8, %v1365_v14 }
0x1509   :  { %1373 = vrot.lane.b32.xlu1 %v1371_v10, %s2820_s3 }
0x157b   :  { %v1374_v18 = vpop.permute.xlu1 %1373 }
0x157c   :  { %v1376_v22 = vadd.f32 %v1374_v18, %v1366_v16 }
0x157e   :  { %2595 = vtanh.f32 %v1376_v22 }
0x157f   :  { %2597 = vrcp.f32 %v1105_v17 }
0x1580   :  { %2599 = vtanh.f32 %v1101_v62 }
0x158b   :  { %v2596_v23 = vpop.eup %2595 }
0x158c   :  { %v2598_v24 = vpop.eup %2597  ;;  %1379 = vrot.lane.b32.xlu0 %v2596_v23, %s2820_s3 }
0x158d   :  { %v2600_v25 = vpop.eup %2599 }
0x158e   :  { %v1109_v26 = vsel %vm101_vm2, %v2598_v24, %v2600_v25 }
0x158f   :  { %v1110_v34 = vmul.f32 %v1109_v26, %v3092_v39 }
0x1590   :  { %1112 = vrot.lane.b32.xlu0 %v1109_v26, %s2820_s3 }
0x15fe   :  { %v1380_v27 = vpop.permute.xlu0 %1379 }
0x15ff   :  { %v1382_v28 = vmul.f32 %v1380_v27, %v1365_v14 }
0x1601   :  { %1385 = vrot.lane.b32.xlu1 %v1382_v28, %s2811_s10 }
0x1602   :  { %v1113_v29 = vpop.permute.xlu0 %1112 }
0x1603   :  { %v1115_v30 = vmul.f32 %v1113_v29, %v1109_v26 }
0x1605   :  { %1117 = vrot.lane.b32.xlu0 %v1115_v30, %s2820_s3 }
0x1673   :  { %v1386_v32 = vpop.permute.xlu1 %1385 }
0x1674   :  { %2436 = vmatmul.mubr.msk.f32.vlgmr.msra.gmra.mxu1 %vm157_vm1, %v1386_v32 }
0x1675   :  { %2450 = vmatpush3.msra.mxu1 %v3113_v40  ;;  %2457 = vmatprep.mubr.msk.f32.mxu1 %vm2819_vm0, %v2818_v0 }
0x1676   :  { %2451 = vmatprep.subr.mxu1 %v2818_v0 }
0x1677   :  { %v1118_v35 = vpop.permute.xlu0 %1117  ;;  %2452 = vmatpush3.msra.mxu1 %v3116_v51 }
0x1678   :  { %v3178_v33 = vadd.f32 %v1118_v35, %v1110_v34  ;;  %2453 = vmatprep.subr.mxu1 %v2818_v0 }
0x1679   :  { %2454 = vmatpush3.msra.mxu1 %v3120_v52 }
0x167a   :  { %2601 = vtanh.f32 %v3178_v33  ;;  %2455 = vmatprep.subr.mxu1 %v2818_v0 }
0x167b   :  { %2456 = vmatpush3.msra.mxu1 %v3124_v53 }
0x167c   :  { %2471 = vmatprep.subr.mxu1 %v2818_v0 }
0x1687   :  { %v2602_v56 = vpop.eup %2601 }
0x1688   :  { %1123 = vrot.lane.b32.xlu0 %v2602_v56, %s2820_s3 }
0x168c   :  { %795 = vrot.lane.b32.xlu0 %v2208_v36, %s2811_s10  ;;  %v1259_v36 = vadd.f32 %v3195_v42, %v3158_v3 }
0x1690   :  { %1019 = vrot.lane.b32.xlu0 %v2210_v37, %s2811_s10 }
0x16fa   :  { %v1124_v38 = vpop.permute.xlu0 %1123 }
0x16fb   :  { %v3203_v2 = vmul.f32 %v1124_v38, %v1109_v26 }
0x16fd   :  { %v2211_v7 = vpack.c.bf16 %v3203_v2, %v3203_v2 }
0x16fe   :  { %v796_v39 = vpop.permute.xlu0 %795 }
0x16ff   :  { %799 = vst.msk [vmem:[#allocation3 + $0x10] sm:$0xf] %vm350_vm3, %v796_v39 }
0x1702   :  { %v1020_v41 = vpop.permute.xlu0 %1019 }
0x1703   :  { %1023 = vst.msk [vmem:[#allocation3 + $0x18] sm:$0xf] %vm350_vm3, %v1020_v41 }
0x1734   :  { %v1455_v63 = vpop.f32.mrf.mxu1 }
0x1735   :  { %v1459_v19 = vadd.f32 %v1455_v63, %v1251_v43 }
0x1736   :  { %v2437_v44 = vpop.f32.mrf.mxu1 }
0x1737   :  { %v2191_v45 = vmul.f32 -1.442695, %v1459_v19 }
0x1739   :  { %2603 = vpow2.f32 %v2191_v45 }
0x173a   :  { %2605 = vtanh.f32 %v1459_v19 }
0x1746   :  { %v2604_v46 = vpop.eup %2603 }
0x1747   :  { %v1463_v47 = vadd.f32 1.0, %v2604_v46  ;;  %v2606_v48 = vpop.eup %2605 }
0x1749   :  { %2607 = vrcp.f32 %v1463_v47 }
0x1756   :  { %v2608_v49 = vpop.eup %2607 }
0x1757   :  { %v1467_v54 = vsel %vm101_vm2, %v2608_v49, %v2606_v48 }
0x1758   :  { %1470 = vrot.lane.b32.xlu1 %v1467_v54, %s2820_s3  ;;  %v1468_v57 = vmul.f32 %v1467_v54, %v1376_v22 }
0x17ca   :  { %v1471_v50 = vpop.permute.xlu1 %1470 }
0x17cb   :  { %v1473_v55 = vmul.f32 %v1471_v50, %v1467_v54 }
0x17cd   :  { %1475 = vrot.lane.b32.xlu1 %v1473_v55, %s2820_s3 }
0x183f   :  { %v1476_v61 = vpop.permute.xlu1 %1475 }
0x1840   :  { %v1478_v62 = vadd.f32 %v1476_v61, %v1468_v57 }
0x1842   :  { %2609 = vtanh.f32 %v1478_v62 }
0x184f   :  { %v2610_v1 = vpop.eup %2609 }
0x1850   :  { %1481 = vrot.lane.b32.xlu1 %v2610_v1, %s2820_s3 }
0x1854   :  { %907 = vrot.lane.b32.xlu1 %v2209_v5, %s2811_s10 }
0x1858   :  { %1131 = vrot.lane.b32.xlu1 %v2211_v7, %s2811_s10 }
0x18c2   :  { %v1482_v9 = vpop.permute.xlu1 %1481 }
0x18c3   :  { %v1484_v11 = vmul.f32 %v1482_v9, %v1467_v54 }
0x18c5   :  { %1487 = vrot.lane.b32.xlu0 %v1484_v11, %s2811_s10 }
0x18c6   :  { %v908_v4 = vpop.permute.xlu1 %907 }
0x18c7   :  { %911 = vst.msk [vmem:[#allocation3 + $0x14] sm:$0xf] %vm350_vm3, %v908_v4 }
0x18ca   :  { %v1132_v13 = vpop.permute.xlu1 %1131 }
0x18cb   :  { %1135 = vst.msk [vmem:[#allocation3 + $0x1c] sm:$0xf] %vm350_vm3, %v1132_v13 }
0x18ce   :  { %v2529_v12 = vld [vmem:[#allocation3 + $0x10] sm:$0xff]  }
0x18cf   :  { %2412 = vmatprep.mubr.msk.bf16.mxu0 %vm157_vm1, %v2529_v12 }
0x18d2   :  { %v2530_v21 = vld [vmem:[#allocation3 + $0x18] sm:$0xff]  }
0x18d3   :  { %2413 = vmatmul.mubr.msk.bf16.gmra.mxu0 %vm157_vm1, %v2530_v21 }
0x18d4   :  { %2446 = vmatprep.mubr.msk.f32.mxu0 %vm2819_vm0, %v2818_v0 }
0x1937   :  { %v1488_v58 = vpop.permute.xlu0 %1487 }
0x1938   :  { %2447 = vmatmul.mubr.msk.f32.vlgmr.msra.gmra.mxu0 %vm157_vm1, %v1488_v58 }
0x1939   :  { %2461 = vmatpush3.msra.mxu0 %v3113_v40  ;;  %2468 = vmatprep.mubr.msk.f32.mxu0 %vm2819_vm0, %v2818_v0 }
0x193a   :  { %2462 = vmatprep.subr.mxu0 %v2818_v0 }
0x193b   :  { %2463 = vmatpush3.msra.mxu0 %v3116_v51 }
0x193c   :  { %2464 = vmatprep.subr.mxu0 %v2818_v0 }
0x193d   :  { %2465 = vmatpush3.msra.mxu0 %v3120_v52 }
0x193e   :  { %2466 = vmatprep.subr.mxu0 %v2818_v0 }
0x193f   :  { %2467 = vmatpush3.msra.mxu0 %v3124_v53 }
0x1940   :  { %2482 = vmatprep.subr.mxu0 %v2818_v0 }
0x1993   :  { %v3229_v6 = vpop.f32.mrf.mxu0 }
0x1995   :  { %v3231_v14 = vpop.f32.mrf.mxu0 }
0x1996   :  { %v1264_v57 = vadd.f32 %v3158_v3, %v3231_v14 }
0x1997   :  { %v3233_v8 = vpop.f32.mrf.mxu0 }
0x1999   :  { %v3235_v10 = vpop.f32.mrf.mxu0 }
0x19f8   :  { %v1557_v15 = vpop.f32.mrf.mxu0 }
0x19f9   :  { %v1561_v16 = vadd.f32 %v1557_v15, %v1256_v59 }
0x19fa   :  { %v2448_v17 = vpop.f32.mrf.mxu0 }
0x19fb   :  { %v2193_v18 = vmul.f32 -1.442695, %v1561_v16 }
0x19fd   :  { %2611 = vpow2.f32 %v2193_v18 }
0x19fe   :  { %2613 = vtanh.f32 %v1561_v16 }
0x1a0a   :  { %v2612_v22 = vpop.eup %2611 }
0x1a0b   :  { %v1565_v23 = vadd.f32 1.0, %v2612_v22  ;;  %v2614_v24 = vpop.eup %2613  ;;  %v1267_v22 = vadd.f32 %v3158_v3, %v3235_v10 }
0x1a0d   :  { %2615 = vrcp.f32 %v1565_v23 }
0x1a1a   :  { %v2616_v25 = vpop.eup %2615 }
0x1a1b   :  { %v1569_v26 = vsel %vm101_vm2, %v2616_v25, %v2614_v24 }
0x1a1c   :  { %1572 = vrot.lane.b32.xlu1 %v1569_v26, %s2820_s3  ;;  %v1570_v60 = vmul.f32 %v1569_v26, %v1478_v62 }
0x1a8e   :  { %v1573_v27 = vpop.permute.xlu1 %1572 }
0x1a8f   :  { %v1575_v28 = vmul.f32 %v1573_v27, %v1569_v26 }
0x1a91   :  { %1577 = vrot.lane.b32.xlu0 %v1575_v28, %s2820_s3 }
0x1b03   :  { %v1578_v29 = vpop.permute.xlu0 %1577 }
0x1b04   :  { %v1580_v30 = vadd.f32 %v1578_v29, %v1570_v60 }
0x1b06   :  { %2617 = vtanh.f32 %v1580_v30 }
0x1b13   :  { %v2618_v32 = vpop.eup %2617 }
0x1b14   :  { %1583 = vrot.lane.b32.xlu1 %v2618_v32, %s2820_s3 }
0x1b86   :  { %v1584_v34 = vpop.permute.xlu1 %1583 }
0x1b87   :  { %v1586_v35 = vmul.f32 %v1584_v34, %v1569_v26 }
0x1b89   :  { %1589 = vrot.lane.b32.xlu0 %v1586_v35, %s2811_s10 }
0x1bfb   :  { %v1590_v56 = vpop.permute.xlu0 %1589 }
0x1bfc   :  { %2458 = vmatmul.mubr.msk.f32.vlgmr.msra.gmra.mxu1 %vm157_vm1, %v1590_v56  ;;  %v1272_v56 = vadd.f32 %v3229_v6, %v3158_v3 }
0x1bfd   :  { %2472 = vmatpush3.msra.mxu1 %v3113_v40  ;;  %2479 = vmatprep.mubr.msk.f32.mxu1 %vm2819_vm0, %v2818_v0 }
0x1bfe   :  { %2473 = vmatprep.subr.mxu1 %v2818_v0 }
0x1bff   :  { %2474 = vmatpush3.msra.mxu1 %v3116_v51 }
0x1c00   :  { %2475 = vmatprep.subr.mxu1 %v2818_v0 }
0x1c01   :  { %2476 = vmatpush3.msra.mxu1 %v3120_v52 }
0x1c02   :  { %2477 = vmatprep.subr.mxu1 %v2818_v0 }
0x1c03   :  { %2478 = vmatpush3.msra.mxu1 %v3124_v53 }
0x1c04   :  { %2493 = vmatprep.subr.mxu1 %v2818_v0 }
0x1cbc   :  { %v1659_v37 = vpop.f32.mrf.mxu1 }
0x1cbd   :  { %v1663_v38 = vadd.f32 %v1659_v37, %v1259_v36 }
0x1cbe   :  { %v2459_v39 = vpop.f32.mrf.mxu1 }
0x1cbf   :  { %v2195_v41 = vmul.f32 -1.442695, %v1663_v38 }
0x1cc1   :  { %2619 = vpow2.f32 %v2195_v41 }
0x1cc2   :  { %2621 = vtanh.f32 %v1663_v38 }
0x1cce   :  { %v2620_v31 = vpop.eup %2619 }
0x1ccf   :  { %v1667_v43 = vadd.f32 1.0, %v2620_v31  ;;  %v2622_v63 = vpop.eup %2621 }
0x1cd1   :  { %2623 = vrcp.f32 %v1667_v43 }
0x1cde   :  { %v2624_v19 = vpop.eup %2623 }
0x1cdf   :  { %v1671_v44 = vsel %vm101_vm2, %v2624_v19, %v2622_v63 }
0x1ce0   :  { %1674 = vrot.lane.b32.xlu1 %v1671_v44, %s2820_s3  ;;  %v1672_v42 = vmul.f32 %v1671_v44, %v1580_v30 }
0x1d52   :  { %v1675_v45 = vpop.permute.xlu1 %1674 }
0x1d53   :  { %v1677_v46 = vmul.f32 %v1675_v45, %v1671_v44 }
0x1d55   :  { %1679 = vrot.lane.b32.xlu0 %v1677_v46, %s2820_s3 }
0x1dc7   :  { %v1680_v47 = vpop.permute.xlu0 %1679 }
0x1dc8   :  { %v1682_v48 = vadd.f32 %v1680_v47, %v1672_v42 }
0x1dca   :  { %2625 = vtanh.f32 %v1682_v48 }
0x1dd7   :  { %v2626_v49 = vpop.eup %2625 }
0x1dd8   :  { %1685 = vrot.lane.b32.xlu1 %v2626_v49, %s2820_s3 }
0x1e4a   :  { %v1686_v54 = vpop.permute.xlu1 %1685 }
0x1e4b   :  { %v1688_v50 = vmul.f32 %v1686_v54, %v1671_v44 }
0x1e4d   :  { %1691 = vrot.lane.b32.xlu0 %v1688_v50, %s2811_s10  ;;  %v1275_v50 = vadd.f32 %v3233_v8, %v3158_v3 }
0x1ebf   :  { %v1692_v55 = vpop.permute.xlu0 %1691 }
0x1ec0   :  { %2469 = vmatmul.mubr.msk.f32.vlgmr.msra.gmra.mxu0 %vm157_vm1, %v1692_v55 }
0x1ec1   :  { %2483 = vmatpush3.msra.mxu0 %v3113_v40  ;;  %2490 = vmatprep.mubr.msk.f32.mxu0 %vm2819_vm0, %v2818_v0 }
0x1ec2   :  { %2484 = vmatprep.subr.mxu0 %v2818_v0 }
0x1ec3   :  { %2485 = vmatpush3.msra.mxu0 %v3116_v51 }
0x1ec4   :  { %2486 = vmatprep.subr.mxu0 %v2818_v0 }
0x1ec5   :  { %2487 = vmatpush3.msra.mxu0 %v3120_v52 }
0x1ec6   :  { %2488 = vmatprep.subr.mxu0 %v2818_v0 }
0x1ec7   :  { %2489 = vmatpush3.msra.mxu0 %v3124_v53 }
0x1f80   :  { %v1761_v61 = vpop.f32.mrf.mxu0 }
0x1f81   :  { %v1765_v62 = vadd.f32 %v1761_v61, %v1264_v57 }
0x1f82   :  { %v2470_v1 = vpop.f32.mrf.mxu0 }
0x1f83   :  { %v2197_v5 = vmul.f32 -1.442695, %v1765_v62 }
0x1f85   :  { %2627 = vpow2.f32 %v2197_v5 }
0x1f86   :  { %2629 = vtanh.f32 %v1765_v62 }
0x1f92   :  { %v2628_v7 = vpop.eup %2627 }
0x1f93   :  { %v1769_v9 = vadd.f32 1.0, %v2628_v7  ;;  %v2630_v11 = vpop.eup %2629 }
0x1f95   :  { %2631 = vrcp.f32 %v1769_v9 }
0x1fa2   :  { %v2632_v4 = vpop.eup %2631 }
0x1fa3   :  { %v1773_v13 = vsel %vm101_vm2, %v2632_v4, %v2630_v11 }
0x1fa4   :  { %1776 = vrot.lane.b32.xlu1 %v1773_v13, %s2820_s3  ;;  %v1774_v58 = vmul.f32 %v1773_v13, %v1682_v48 }
0x2016   :  { %v1777_v12 = vpop.permute.xlu1 %1776 }
0x2017   :  { %v1779_v21 = vmul.f32 %v1777_v12, %v1773_v13 }
0x2019   :  { %1781 = vrot.lane.b32.xlu0 %v1779_v21, %s2820_s3 }
0x208b   :  { %v1782_v14 = vpop.permute.xlu0 %1781 }
0x208c   :  { %v1784_v59 = vadd.f32 %v1782_v14, %v1774_v58 }
0x208e   :  { %2633 = vtanh.f32 %v1784_v59 }
0x209b   :  { %v2634_v15 = vpop.eup %2633 }
0x209c   :  { %1787 = vrot.lane.b32.xlu1 %v2634_v15, %s2820_s3 }
0x210e   :  { %v1788_v16 = vpop.permute.xlu1 %1787 }
0x210f   :  { %v1790_v17 = vmul.f32 %v1788_v16, %v1773_v13 }
0x2111   :  { %1793 = vrot.lane.b32.xlu0 %v1790_v17, %s2811_s10 }
0x2183   :  { %v1794_v18 = vpop.permute.xlu0 %1793 }
0x2184   :  { %2480 = vmatmul.mubr.msk.f32.vlgmr.msra.gmra.mxu1 %vm157_vm1, %v1794_v18 }
0x2185   :  { %2494 = vmatpush3.msra.mxu1 %v3113_v40  ;;  %2501 = vmatprep.mubr.msk.f32.mxu1 %vm2819_vm0, %v2818_v0 }
0x2186   :  { %2495 = vmatprep.subr.mxu1 %v2818_v0 }
0x2187   :  { %2496 = vmatpush3.msra.mxu1 %v3116_v51 }
0x2188   :  { %2497 = vmatprep.subr.mxu1 %v2818_v0 }
0x2189   :  { %2498 = vmatpush3.msra.mxu1 %v3120_v52 }
0x218a   :  { %2499 = vmatprep.subr.mxu1 %v2818_v0 }
0x218b   :  { %2500 = vmatpush3.msra.mxu1 %v3124_v53 }
0x2244   :  { %v1863_v23 = vpop.f32.mrf.mxu1 }
0x2245   :  { %v1867_v40 = vadd.f32 %v1863_v23, %v1267_v22 }
0x2246   :  { %v2481_v24 = vpop.f32.mrf.mxu1 }
0x2247   :  { %v2199_v25 = vmul.f32 -1.442695, %v1867_v40 }
0x2249   :  { %2635 = vpow2.f32 %v2199_v25 }
0x224a   :  { %2637 = vtanh.f32 %v1867_v40 }
0x2256   :  { %v2636_v26 = vpop.eup %2635 }
0x2257   :  { %v1871_v27 = vadd.f32 1.0, %v2636_v26  ;;  %v2638_v51 = vpop.eup %2637 }
0x2259   :  { %2639 = vrcp.f32 %v1871_v27 }
0x2266   :  { %v2640_v28 = vpop.eup %2639 }
0x2267   :  { %v1875_v52 = vsel %vm101_vm2, %v2640_v28, %v2638_v51 }
0x2268   :  { %1878 = vrot.lane.b32.xlu1 %v1875_v52, %s2820_s3  ;;  %v1876_v10 = vmul.f32 %v1875_v52, %v1784_v59 }
0x22da   :  { %v1879_v0 = vpop.permute.xlu1 %1878 }
0x22db   :  { %v1881_v53 = vmul.f32 %v1879_v0, %v1875_v52 }
0x22dd   :  { %1883 = vrot.lane.b32.xlu0 %v1881_v53, %s2820_s3 }
0x234f   :  { %v1884_v60 = vpop.permute.xlu0 %1883 }
0x2350   :  { %v1886_v29 = vadd.f32 %v1884_v60, %v1876_v10 }
0x2352   :  { %2641 = vtanh.f32 %v1886_v29 }
0x235f   :  { %v2642_v30 = vpop.eup %2641 }
0x2360   :  { %1889 = vrot.lane.b32.xlu1 %v2642_v30, %s2820_s3 }
0x23d2   :  { %v1890_v32 = vpop.permute.xlu1 %1889 }
0x23d3   :  { %v1892_v34 = vmul.f32 %v1890_v32, %v1875_v52 }
0x23d5   :  { %1895 = vrot.lane.b32.xlu0 %v1892_v34, %s2811_s10 }
0x2447   :  { %v1896_v35 = vpop.permute.xlu0 %1895 }
0x2448   :  { %2491 = vmatmul.mubr.msk.f32.vlgmr.msra.gmra.mxu0 %vm157_vm1, %v1896_v35 }
0x2508   :  { %v1965_v36 = vpop.f32.mrf.mxu0 }
0x2509   :  { %v1969_v37 = vadd.f32 %v1965_v36, %v1272_v56 }
0x250a   :  { %v2492_v38 = vpop.f32.mrf.mxu0 }
0x250b   :  { %v2201_v39 = vmul.f32 -1.442695, %v1969_v37 }
0x250d   :  { %2643 = vpow2.f32 %v2201_v39 }
0x250e   :  { %2645 = vtanh.f32 %v1969_v37 }
0x251a   :  { %v2644_v41 = vpop.eup %2643 }
0x251b   :  { %v1973_v31 = vadd.f32 1.0, %v2644_v41  ;;  %v2646_v43 = vpop.eup %2645 }
0x251d   :  { %2647 = vrcp.f32 %v1973_v31 }
0x252a   :  { %v2648_v63 = vpop.eup %2647 }
0x252b   :  { %v1977_v19 = vsel %vm101_vm2, %v2648_v63, %v2646_v43 }
0x252c   :  { %1980 = vrot.lane.b32.xlu1 %v1977_v19, %s2820_s3  ;;  %v1978_v6 = vmul.f32 %v1977_v19, %v1886_v29 }
0x259e   :  { %v1981_v44 = vpop.permute.xlu1 %1980 }
0x259f   :  { %v1983_v45 = vmul.f32 %v1981_v44, %v1977_v19 }
0x25a1   :  { %1985 = vrot.lane.b32.xlu0 %v1983_v45, %s2820_s3 }
0x2613   :  { %v1986_v46 = vpop.permute.xlu0 %1985 }
0x2614   :  { %v1988_v42 = vadd.f32 %v1986_v46, %v1978_v6 }
0x2616   :  { %2649 = vtanh.f32 %v1988_v42 }
0x2623   :  { %v2650_v47 = vpop.eup %2649 }
0x2624   :  { %1991 = vrot.lane.b32.xlu1 %v2650_v47, %s2820_s3 }
0x2696   :  { %v1992_v48 = vpop.permute.xlu1 %1991 }
0x2697   :  { %v1994_v49 = vmul.f32 %v1992_v48, %v1977_v19 }
0x2699   :  { %1997 = vrot.lane.b32.xlu0 %v1994_v49, %s2811_s10 }
0x270b   :  { %v1998_v54 = vpop.permute.xlu0 %1997 }
0x270c   :  { %2502 = vmatmul.mubr.msk.f32.vlgmr.msra.gmra.mxu1 %vm157_vm1, %v1998_v54 }
0x27cc   :  { %v2067_v55 = vpop.f32.mrf.mxu1 }
0x27cd   :  { %v2071_v57 = vadd.f32 %v2067_v55, %v1275_v50 }
0x27ce   :  { %v2503_v61 = vpop.f32.mrf.mxu1 }
0x27cf   :  { %v2203_v62 = vmul.f32 -1.442695, %v2071_v57 }
0x27d1   :  { %2651 = vpow2.f32 %v2203_v62 }
0x27d2   :  { %2653 = vtanh.f32 %v2071_v57 }
0x27de   :  { %v2652_v1 = vpop.eup %2651 }
0x27df   :  { %v2075_v5 = vadd.f32 1.0, %v2652_v1  ;;  %v2654_v7 = vpop.eup %2653 }
0x27e1   :  { %2655 = vrcp.f32 %v2075_v5 }
0x27ee   :  { %v2656_v9 = vpop.eup %2655 }
0x27ef   :  { %v2079_v11 = vsel %vm101_vm2, %v2656_v9, %v2654_v7 }
0x27f0   :  { %2082 = vrot.lane.b32.xlu1 %v2079_v11, %s2820_s3  ;;  %v2080_v3 = vmul.f32 %v2079_v11, %v1988_v42 }
0x2862   :  { %v2083_v4 = vpop.permute.xlu1 %2082 }
0x2863   :  { %v2085_v13 = vmul.f32 %v2083_v4, %v2079_v11 }
0x2865   :  { %2087 = vrot.lane.b32.xlu0 %v2085_v13, %s2820_s3 }
0x2869   :  { %1137 = vrot.lane.b32.xlu0 %v3203_v2, %s2811_s10 }
0x28d7   :  { %v2088_v8 = vpop.permute.xlu0 %2087 }
0x28d8   :  { %v2090_v12 = vadd.f32 %v2088_v8, %v2080_v3 }
0x28da   :  { %2657 = vtanh.f32 %v2090_v12 }
0x28db   :  { %v1138_v21 = vpop.permute.xlu0 %1137 }
0x28dc   :  { %1140 = vst.msk [vmem:[#allocation13] sm:$0xff] %vm157_vm1, %v1138_v21 }
0x28e7   :  { %v2658_v58 = vpop.eup %2657 }
0x28e8   :  { %2093 = vrot.lane.b32.xlu1 %v2658_v58, %s2820_s3 }
0x28ec   :  { %1142 = vrot.lane.b32.xlu1 %v3178_v33, %s2821_s6 }
0x28f0   :  { %2104 = vrot.lane.b32.xlu1 %v2090_v12, %s2821_s6 }
0x295a   :  { %v2094_v20 = vpop.permute.xlu1 %2093 }
0x295b   :  { %v2096_v14 = vmul.f32 %v2094_v20, %v2079_v11 }
0x295d   :  { %2098 = vrot.lane.b32.xlu0 %v2096_v14, %s2811_s10 }
0x295e   :  { %v1143_v59 = vpop.permute.xlu1 %1142 }
0x295f   :  { %1145 = vst.msk [vmem:[#allocation14] sm:$0xff] %vm157_vm1, %v1143_v59 }
0x2962   :  { %v2105_v2 = vpop.permute.xlu1 %2104 }
0x2963   :  { %2108 = vst.msk [vmem:[#allocation14 + $0x8] sm:$0xff] %vm157_vm1, %v2105_v2 }
0x2964   :  { %2770 = shalt.err (!%p2767_p1)
}
0x2965   :  { %2132 = dma.vmem_to_hbm [thread:$0]  %s2127_s13, 256, %s3345_s8, [#allocation15], %s2815_s23, %s2815_s23, %s2816_s24  }
0x2966   :  { %s2823_s16 = smov [#allocation13]  }
0x2967   :  { %s2114_s17 = sshll.u32 %s2823_s16, 4  ;;  %s2115_s17 = int_to_ptr.vmem [resolvable:$true] %s2114_s17 }
0x2968   :  { %s2779_s18 = scalar_lea.vmem %s2115_s17, 256  ;;  %p2784_p3 = scmp.lt.s32.totalorder %s2115_s17, %s2115_s17 }
0x2969   :  { %p2780_p2 = scmp.ne.s32.totalorder %s2115_s17, %s2779_s18  ;;  %p2785_p4 = scmp.lt.s32.totalorder %s2779_s18, %s2779_s18 }
0x296b   :  { %p2786_p5 = por %p2785_p4, %p2784_p3 }
0x296d   :  { %p2787_p6 = pnand %p2786_p5, %p2780_p2 }
0x29cf   :  { %v2099_v33 = vpop.permute.xlu0 %2098 }
0x29d0   :  { %2102 = vst.msk [vmem:[#allocation13 + $0x8] sm:$0xff] %vm157_vm1, %v2099_v33 }
0x29d1   :  { %2790 = shalt.err (!%p2787_p6)
}
0x29d2   :  { %2120 = dma.vmem_to_hbm [thread:$0]  %s2115_s17, 256, %s3344_s7, [#allocation6], %s2815_s23, %s2815_s23, %s2816_s24  }
0x29d3   :  { %2805 = dma.done.wait [#allocation6], 256  }
0x29d4   :  { %2806 = vsyncadd [#allocation6], 4294967040 }
0x29d5   :  { %2807 = dma.done.wait [#allocation15], 256  }
0x29d6   :  { %2808 = vsyncadd [#allocation15], 4294967040 }
0x29d7   :  { %2139 = vsyncpa [#allocation5], 1 }
0x29d8   :  { %2140 = vsyncpa [#allocation8], 1 }
0x29d9   :  { %2141 = vsyncpa [#allocation11], 1 }
0x29da   :  { %2142 = vsyncpa [#allocation6], 1 }
0x29db   :  { %2143 = vsyncpa [#allocation15], 1 }

</bundles_post_ra>
